<compile_context>
chip_gen: v6e
topology: v6e:2x2x1
jax: 0.10.0
libtpu: 0.0.40
codegen_flags: <defaults>
</compile_context>

<pallas_src>
import functools

import jax
import jax.numpy as jnp
from jax.experimental import pallas as pl
from jax.experimental.pallas import tpu as pltpu


_VMEM_SPEC = pl.BlockSpec(memory_space=pltpu.MemorySpace.VMEM)


# ----------------------------------------------------------------------------
# Fused bidirectional LSTM: both directions interleaved in one program.
# ----------------------------------------------------------------------------

def _bilstm_kernel(T, B, H, has_init, need_seq, *refs):
    it = iter(refs)
    x_ref = next(it)           # (T*B, E)   f32
    wih_ref = next(it)         # (E, 8H)    bf16  (fwd cols [:4H], rev [4H:])
    whh_ref = next(it)         # (2, H, 4H) bf16
    b_ref = next(it)           # (1, 8H)    f32   (b_ih + b_hh pre-summed)
    if has_init:
        h0_ref = next(it)      # (2, B, H)
        c0_ref = next(it)      # (2, B, H)
    out_ref = next(it) if need_seq else None   # (T, B, 2H)
    sum_ref = next(it)         # (B, 2H)  sum over time of the output
    hT_ref = next(it)          # (2, B, H)
    cT_ref = next(it)          # (2, B, H)

    H4 = 4 * H

    # Hoisted input projection for BOTH directions: one MXU pass + bias.
    xw = jnp.dot(x_ref[...].astype(jnp.bfloat16), wih_ref[...],
                 preferred_element_type=jnp.float32) + b_ref[...]   # (T*B, 8H)

    whh_f = whh_ref[0]
    whh_r = whh_ref[1]

    if has_init:
        h_f, c_f = h0_ref[0], c0_ref[0]
        h_r, c_r = h0_ref[1], c0_ref[1]
    else:
        z = jnp.zeros((B, H), jnp.float32)
        h_f, c_f, h_r, c_r = z, z, z, z

    def cell(pre, h, c, whh):
        g = pre + jnp.dot(h.astype(jnp.bfloat16), whh,
                          preferred_element_type=jnp.float32)
        i = jax.nn.sigmoid(g[:, 0 * H:1 * H])
        f = jax.nn.sigmoid(g[:, 1 * H:2 * H])
        gg = jnp.tanh(g[:, 2 * H:3 * H])
        o = jax.nn.sigmoid(g[:, 3 * H:4 * H])
        c_new = f * c + i * gg
        h_new = o * jnp.tanh(c_new)
        return h_new, c_new

    acc_f = jnp.zeros((B, H), jnp.float32)
    acc_r = jnp.zeros((B, H), jnp.float32)
    hs_f, hs_r = [], []

    # Fully static time loop (T small & static): fwd reads time t, rev reads
    # time T-1-t — both Python constants, so no dynamic addressing in the
    # latency-bound recurrence.
    for t in range(T):
        tr = T - 1 - t
        pre_f = xw[t * B:(t + 1) * B, 0:H4]
        pre_r = xw[tr * B:(tr + 1) * B, H4:2 * H4]
        h_f, c_f = cell(pre_f, h_f, c_f, whh_f)
        h_r, c_r = cell(pre_r, h_r, c_r, whh_r)
        acc_f = acc_f + h_f
        acc_r = acc_r + h_r
        if need_seq:
            hs_f.append(h_f)
            hs_r.append(h_r)

    sum_ref[...] = jnp.concatenate([acc_f, acc_r], axis=-1)
    hT_ref[...] = jnp.stack([h_f, h_r], axis=0)
    cT_ref[...] = jnp.stack([c_f, c_r], axis=0)
    if need_seq:
        seq_f = jnp.stack(hs_f, axis=0)             # (T, B, H), time 0..T-1
        seq_r = jnp.stack(hs_r[::-1], axis=0)       # restore time order
        out_ref[...] = jnp.concatenate([seq_f, seq_r], axis=-1)


def bilstm(x, p, hidden=None, need_seq=True):
    """Bidirectional 1-layer LSTM.

    x: (T, B, E) f32.
    p: {"wih": (E, 8H) bf16, "whh": (2, H, 4H) bf16, "b": (1, 8H) f32}.
    Returns (seq or None, time_sum (B, 2H), (hT, cT) each (2, B, H)).
    """
    T, B, E = x.shape
    H = p["whh"].shape[1]
    x2d = x.reshape(T * B, E)          # flatten in the wrapper, not in-kernel

    args = [x2d, p["wih"], p["whh"], p["b"]]
    has_init = hidden is not None
    if has_init:
        h0, c0 = hidden
        args += [h0, c0]

    out_shapes, out_specs = [], []
    if need_seq:
        out_shapes.append(jax.ShapeDtypeStruct((T, B, 2 * H), jnp.float32))
        out_specs.append(_VMEM_SPEC)
    out_shapes += [jax.ShapeDtypeStruct((B, 2 * H), jnp.float32),
                   jax.ShapeDtypeStruct((2, B, H), jnp.float32),
                   jax.ShapeDtypeStruct((2, B, H), jnp.float32)]
    out_specs += [_VMEM_SPEC] * 3

    kernel = functools.partial(_bilstm_kernel, T, B, H, has_init, need_seq)
    outs = pl.pallas_call(
        kernel,
        out_shape=tuple(out_shapes),
        in_specs=[_VMEM_SPEC] * len(args),
        out_specs=tuple(out_specs),
    )(*args)

    if need_seq:
        seq, s, hT, cT = outs
        return seq, s, (hT, cT)
    s, hT, cT = outs
    return None, s, (hT, cT)


# ----------------------------------------------------------------------------
# Single fused epilogue kernel:
#   linear1 head + every prev-hop concat+linear update + cosine similarity.
# ----------------------------------------------------------------------------

def _epilogue_kernel(Tq, prev_lens, cur_len, *refs):
    n_prev = len(prev_lens)
    it = iter(refs)
    qs1 = next(it)[...]                      # (B, 2H)
    qs2 = next(it)[...]                      # (B, 2H)
    w1 = next(it)[...]                       # (2H, 2H) bf16
    b1 = next(it)[...]                       # (1, 2H)  f32
    if n_prev:
        wl = next(it)[...]                   # (4H, 2H) bf16
        bl = next(it)[...]                   # (1, 2H)  f32
    hop_sums = [(next(it)[...], next(it)[...]) for _ in range(n_prev)]
    crs = next(it)[...]                      # (B, 2H)
    cts = next(it)[...]                      # (B, 2H)
    o_ref = next(it)                         # (B, 1)

    H2 = qs1.shape[1]

    # ques_h = linear1(mean_t(hs1 + hs2))
    ques_h = jnp.dot(((qs1 + qs2) * (1.0 / Tq)).astype(jnp.bfloat16), w1,
                     preferred_element_type=jnp.float32) + b1

    # per previous-hop: ques_h = linear(cat(ques_h, prev_rela_h))  (split matmul)
    for (prs, pts), plen in zip(hop_sums, prev_lens):
        prev_h = (prs + pts) * (1.0 / plen)
        ques_h = (jnp.dot(ques_h.astype(jnp.bfloat16), wl[:H2, :],
                          preferred_element_type=jnp.float32)
                  + jnp.dot(prev_h.astype(jnp.bfloat16), wl[H2:, :],
                            preferred_element_type=jnp.float32)
                  + bl)

    rela_h = (crs + cts) * (1.0 / cur_len)

    # torch.nn.CosineSimilarity(dim=1, eps=1e-8): clamp the norm product.
    dot = jnp.sum(ques_h * rela_h, axis=1, keepdims=True)
    nq = jnp.sqrt(jnp.sum(ques_h * ques_h, axis=1, keepdims=True))
    nr = jnp.sqrt(jnp.sum(rela_h * rela_h, axis=1, keepdims=True))
    o_ref[...] = dot / jnp.maximum(nq * nr, 1e-8)


def epilogue(params, Tq, qsum1, qsum2, hop_sums, hop_lens, crs, cts, cur_len):
    args = [qsum1, qsum2, params["linear1_wt"], params["linear1_b"]]
    if hop_sums:
        args += [params["linear_wt"], params["linear_b"]]
    for prs, pts in hop_sums:
        args += [prs, pts]
    args += [crs, cts]

    B = qsum1.shape[0]
    kernel = functools.partial(_epilogue_kernel, Tq, tuple(hop_lens), cur_len)
    out = pl.pallas_call(
        kernel,
        out_shape=jax.ShapeDtypeStruct((B, 1), jnp.float32),
        in_specs=[_VMEM_SPEC] * len(args),
        out_specs=_VMEM_SPEC,
    )(*args)
    return out[:, 0]


# ----------------------------------------------------------------------------
# Model glue (plain JAX: embedding gathers + static orchestration)
# ----------------------------------------------------------------------------

def rela_sums(params, rela_text_x, rela_x, ques_hidden_state):
    # (B, T) int -> transpose -> embed -> (T, B, E)
    rela_text_e = jnp.take(params["word_emb"], rela_text_x.T, axis=0)
    rela_e = jnp.take(params["rela_emb"], rela_x.T, axis=0)
    _, rsum, hidden = bilstm(rela_e, params["rnn"], ques_hidden_state,
                             need_seq=False)
    _, tsum, _ = bilstm(rela_text_e, params["rnn"], hidden, need_seq=False)
    total_len = rela_e.shape[0] + rela_text_e.shape[0]
    return rsum, tsum, total_len


def model_forward(params, ques_x, rela_text_x, rela_x,
                  prev_rela_text_x, prev_rela_x):
    # Dropout layers are identity in inference mode.
    ques_e = jnp.take(params["word_emb"], ques_x.T, axis=0)     # (Tq, B, E)
    Tq = ques_e.shape[0]
    ques_hs1, qsum1, ques_hidden = bilstm(ques_e, params["rnn"], need_seq=True)
    _, qsum2, _ = bilstm(ques_hs1, params["rnn2"], need_seq=False)

    hop_sums, hop_lens = [], []
    for prev_text, prev_rela in zip(prev_rela_text_x, prev_rela_x):
        if prev_rela.shape[0] > 0:
            prs, pts, plen = rela_sums(params, prev_text, prev_rela,
                                       ques_hidden)
            hop_sums.append((prs, pts))
            hop_lens.append(plen)

    crs, cts, clen = rela_sums(params, rela_text_x, rela_x, ques_hidden)

    return epilogue(params, Tq, qsum1, qsum2, hop_sums, hop_lens,
                    crs, cts, clen)                              # (B,)


# ----------------------------------------------------------------------------
# Deterministic parameter construction
# ----------------------------------------------------------------------------

def make_params(key, vocab_w, vocab_r, emb, H):
    ks = iter(jax.random.split(key, 32))

    def nrm(shape, scale=0.1, dtype=jnp.float32):
        return (scale * jax.random.normal(next(ks), shape)).astype(dtype)

    def lstm_params(in_dim):
        # fwd/rev input-hidden weights concatenated on the output axis
        # (in, 8H); whh stacked per direction (2, H, 4H); bias pre-summed
        # (b_ih + b_hh) for both directions (1, 8H).  Weights stored bf16.
        return {
            "wih": nrm((in_dim, 8 * H), dtype=jnp.bfloat16),
            "whh": nrm((2, H, 4 * H), dtype=jnp.bfloat16),
            "b": nrm((1, 8 * H)),
        }

    return {
        "word_emb": nrm((vocab_w, emb), 1.0),
        "rela_emb": nrm((vocab_r, emb), 1.0),
        "rnn": lstm_params(emb),
        "rnn2": lstm_params(2 * H),
        # linear1: bert_config.hidden_size (== 2H in this path) -> 2H
        "linear1_wt": nrm((2 * H, 2 * H), dtype=jnp.bfloat16),
        "linear1_b": nrm((1, 2 * H)),
        # linear: 4H -> 2H
        "linear_wt": nrm((4 * H, 2 * H), dtype=jnp.bfloat16),
        "linear_b": nrm((1, 2 * H)),
    }


# ----------------------------------------------------------------------------
# Main
# ----------------------------------------------------------------------------

if __name__ == "__main__":
    B, Tq, Tr, Tt = 2, 8, 3, 5
    EMB, H = 16, 32            # emb_size=16, hidden_size=32 -> 2H=64, 4H=128
    VOCAB_W, VOCAB_R = 50, 20

    key = jax.random.PRNGKey(0)
    kp, k1, k2, k3, k4, k5 = jax.random.split(key, 6)
    params = make_params(kp, VOCAB_W, VOCAB_R, EMB, H)

    ques_x = jax.random.randint(k1, (B, Tq), 0, VOCAB_W, dtype=jnp.int32)
    rela_text_x = jax.random.randint(k2, (B, Tt), 0, VOCAB_W, dtype=jnp.int32)
    rela_x = jax.random.randint(k3, (B, Tr), 0, VOCAB_R, dtype=jnp.int32)
    # one previous-hop relation (exercises the linear(4H -> 2H) update)
    prev_rela_text_x = [jax.random.randint(k4, (B, 4), 0, VOCAB_W,
                                           dtype=jnp.int32)]
    prev_rela_x = [jax.random.randint(k5, (B, 2), 0, VOCAB_R,
                                      dtype=jnp.int32)]

    out = model_forward(params, ques_x, rela_text_x, rela_x,
                        prev_rela_text_x, prev_rela_x)
    out = jax.block_until_ready(out)
    assert out.shape == (B,) and bool(jnp.all(jnp.isfinite(out)))
    print("KERNEL_OK")
</pallas_src>

<mosaic_0001>
module attributes {stable_mosaic.version = 11 : i64} {
  func.func @_bilstm_kernel(%arg0: memref<16x16xf32, #tpu.memory_space<vmem>>, %arg1: memref<16x256xbf16, #tpu.memory_space<vmem>>, %arg2: memref<2x32x128xbf16, #tpu.memory_space<vmem>>, %arg3: memref<1x256xf32, #tpu.memory_space<vmem>>, %arg4: memref<8x2x64xf32, #tpu.memory_space<vmem>>, %arg5: memref<2x64xf32, #tpu.memory_space<vmem>>, %arg6: memref<2x2x32xf32, #tpu.memory_space<vmem>>, %arg7: memref<2x2x32xf32, #tpu.memory_space<vmem>>) attributes {dimension_semantics = [], scalar_prefetch = 0 : i64, scratch_operands = 0 : i64, tpu.core_type = #tpu.core_type<tc>} {
    %c0 = arith.constant 0 : index
    %c0_0 = arith.constant 0 : index
    %0 = vector.load %arg0[%c0, %c0_0] : memref<16x16xf32, #tpu.memory_space<vmem>>, vector<16x16xf32>
    %1 = arith.truncf %0 : vector<16x16xf32> to vector<16x16xbf16>
    %c0_1 = arith.constant 0 : index
    %c0_2 = arith.constant 0 : index
    %2 = vector.load %arg1[%c0_1, %c0_2] : memref<16x256xbf16, #tpu.memory_space<vmem>>, vector<16x256xbf16>
    %cst = arith.constant dense<0.000000e+00> : vector<16x256xf32>
    %3 = tpu.matmul %1, %2, %cst {dimension_numbers = #tpu.dot_dimension_numbers<[1], [0], [0], [1], [0, 0, 1, 1], [], []>} : vector<16x16xbf16>, vector<16x256xbf16>, vector<16x256xf32> -> vector<16x256xf32>
    %c0_3 = arith.constant 0 : index
    %c0_4 = arith.constant 0 : index
    %4 = vector.load %arg3[%c0_3, %c0_4] : memref<1x256xf32, #tpu.memory_space<vmem>>, vector<1x256xf32>
    %5 = vector.broadcast %4 : vector<1x256xf32> to vector<16x256xf32>
    %6 = arith.addf %3, %5 : vector<16x256xf32>
    %c0_5 = arith.constant 0 : index
    %c0_6 = arith.constant 0 : index
    %c0_7 = arith.constant 0 : index
    %7 = vector.load %arg2[%c0_5, %c0_6, %c0_7] : memref<2x32x128xbf16, #tpu.memory_space<vmem>>, vector<1x32x128xbf16>
    %8 = vector.shape_cast %7 : vector<1x32x128xbf16> to vector<32x128xbf16>
    %c1 = arith.constant 1 : index
    %c0_8 = arith.constant 0 : index
    %c0_9 = arith.constant 0 : index
    %9 = vector.load %arg2[%c1, %c0_8, %c0_9] : memref<2x32x128xbf16, #tpu.memory_space<vmem>>, vector<1x32x128xbf16>
    %10 = vector.shape_cast %9 : vector<1x32x128xbf16> to vector<32x128xbf16>
    %cst_10 = arith.constant 0.000000e+00 : f32
    %11 = vector.broadcast %cst_10 : f32 to vector<2x32xf32>
    %cst_11 = arith.constant 0.000000e+00 : f32
    %12 = vector.broadcast %cst_11 : f32 to vector<2x32xf32>
    %cst_12 = arith.constant 0.000000e+00 : f32
    %13 = vector.broadcast %cst_12 : f32 to vector<2x32xf32>
    %14 = vector.extract_strided_slice %6 {offsets = [0, 0], sizes = [2, 128], strides = [1, 1]} : vector<16x256xf32> to vector<2x128xf32>
    %15 = vector.extract_strided_slice %6 {offsets = [14, 128], sizes = [2, 128], strides = [1, 1]} : vector<16x256xf32> to vector<2x128xf32>
    %16 = arith.truncf %11 : vector<2x32xf32> to vector<2x32xbf16>
    %cst_13 = arith.constant dense<0.000000e+00> : vector<2x128xf32>
    %17 = tpu.matmul %16, %8, %cst_13 {dimension_numbers = #tpu.dot_dimension_numbers<[1], [0], [0], [1], [0, 0, 1, 1], [], []>} : vector<2x32xbf16>, vector<32x128xbf16>, vector<2x128xf32> -> vector<2x128xf32>
    %18 = arith.addf %14, %17 : vector<2x128xf32>
    %19 = vector.extract_strided_slice %18 {offsets = [0, 0], sizes = [2, 32], strides = [1, 1]} : vector<2x128xf32> to vector<2x32xf32>
    %20 = arith.negf %19 : vector<2x32xf32>
    %21 = math.exp %20 : vector<2x32xf32>
    %cst_14 = arith.constant 1.000000e+00 : f32
    %22 = vector.broadcast %cst_14 : f32 to vector<2x32xf32>
    %23 = arith.addf %22, %21 : vector<2x32xf32>
    %24 = arith.divf %22, %23 : vector<2x32xf32>
    %25 = vector.extract_strided_slice %18 {offsets = [0, 32], sizes = [2, 32], strides = [1, 1]} : vector<2x128xf32> to vector<2x32xf32>
    %26 = arith.negf %25 : vector<2x32xf32>
    %27 = math.exp %26 : vector<2x32xf32>
    %cst_15 = arith.constant 1.000000e+00 : f32
    %28 = vector.broadcast %cst_15 : f32 to vector<2x32xf32>
    %29 = arith.addf %28, %27 : vector<2x32xf32>
    %30 = arith.divf %28, %29 : vector<2x32xf32>
    %31 = vector.extract_strided_slice %18 {offsets = [0, 64], sizes = [2, 32], strides = [1, 1]} : vector<2x128xf32> to vector<2x32xf32>
    %32 = math.tanh %31 : vector<2x32xf32>
    %33 = vector.extract_strided_slice %18 {offsets = [0, 96], sizes = [2, 32], strides = [1, 1]} : vector<2x128xf32> to vector<2x32xf32>
    %34 = arith.negf %33 : vector<2x32xf32>
    %35 = math.exp %34 : vector<2x32xf32>
    %cst_16 = arith.constant 1.000000e+00 : f32
    %36 = vector.broadcast %cst_16 : f32 to vector<2x32xf32>
    %37 = arith.addf %36, %35 : vector<2x32xf32>
    %38 = arith.divf %36, %37 : vector<2x32xf32>
    %39 = arith.mulf %30, %11 : vector<2x32xf32>
    %40 = arith.mulf %24, %32 : vector<2x32xf32>
    %41 = arith.addf %39, %40 : vector<2x32xf32>
    %42 = math.tanh %41 : vector<2x32xf32>
    %43 = arith.mulf %38, %42 : vector<2x32xf32>
    %44 = arith.truncf %11 : vector<2x32xf32> to vector<2x32xbf16>
    %cst_17 = arith.constant dense<0.000000e+00> : vector<2x128xf32>
    %45 = tpu.matmul %44, %10, %cst_17 {dimension_numbers = #tpu.dot_dimension_numbers<[1], [0], [0], [1], [0, 0, 1, 1], [], []>} : vector<2x32xbf16>, vector<32x128xbf16>, vector<2x128xf32> -> vector<2x128xf32>
    %46 = arith.addf %15, %45 : vector<2x128xf32>
    %47 = vector.extract_strided_slice %46 {offsets = [0, 0], sizes = [2, 32], strides = [1, 1]} : vector<2x128xf32> to vector<2x32xf32>
    %48 = arith.negf %47 : vector<2x32xf32>
    %49 = math.exp %48 : vector<2x32xf32>
    %cst_18 = arith.constant 1.000000e+00 : f32
    %50 = vector.broadcast %cst_18 : f32 to vector<2x32xf32>
    %51 = arith.addf %50, %49 : vector<2x32xf32>
    %52 = arith.divf %50, %51 : vector<2x32xf32>
    %53 = vector.extract_strided_slice %46 {offsets = [0, 32], sizes = [2, 32], strides = [1, 1]} : vector<2x128xf32> to vector<2x32xf32>
    %54 = arith.negf %53 : vector<2x32xf32>
    %55 = math.exp %54 : vector<2x32xf32>
    %cst_19 = arith.constant 1.000000e+00 : f32
    %56 = vector.broadcast %cst_19 : f32 to vector<2x32xf32>
    %57 = arith.addf %56, %55 : vector<2x32xf32>
    %58 = arith.divf %56, %57 : vector<2x32xf32>
    %59 = vector.extract_strided_slice %46 {offsets = [0, 64], sizes = [2, 32], strides = [1, 1]} : vector<2x128xf32> to vector<2x32xf32>
    %60 = math.tanh %59 : vector<2x32xf32>
    %61 = vector.extract_strided_slice %46 {offsets = [0, 96], sizes = [2, 32], strides = [1, 1]} : vector<2x128xf32> to vector<2x32xf32>
    %62 = arith.negf %61 : vector<2x32xf32>
    %63 = math.exp %62 : vector<2x32xf32>
    %cst_20 = arith.constant 1.000000e+00 : f32
    %64 = vector.broadcast %cst_20 : f32 to vector<2x32xf32>
    %65 = arith.addf %64, %63 : vector<2x32xf32>
    %66 = arith.divf %64, %65 : vector<2x32xf32>
    %67 = arith.mulf %58, %11 : vector<2x32xf32>
    %68 = arith.mulf %52, %60 : vector<2x32xf32>
    %69 = arith.addf %67, %68 : vector<2x32xf32>
    %70 = math.tanh %69 : vector<2x32xf32>
    %71 = arith.mulf %66, %70 : vector<2x32xf32>
    %72 = arith.addf %12, %43 : vector<2x32xf32>
    %73 = arith.addf %13, %71 : vector<2x32xf32>
    %74 = vector.extract_strided_slice %6 {offsets = [2, 0], sizes = [2, 128], strides = [1, 1]} : vector<16x256xf32> to vector<2x128xf32>
    %75 = vector.extract_strided_slice %6 {offsets = [12, 128], sizes = [2, 128], strides = [1, 1]} : vector<16x256xf32> to vector<2x128xf32>
    %76 = arith.truncf %43 : vector<2x32xf32> to vector<2x32xbf16>
    %cst_21 = arith.constant dense<0.000000e+00> : vector<2x128xf32>
    %77 = tpu.matmul %76, %8, %cst_21 {dimension_numbers = #tpu.dot_dimension_numbers<[1], [0], [0], [1], [0, 0, 1, 1], [], []>} : vector<2x32xbf16>, vector<32x128xbf16>, vector<2x128xf32> -> vector<2x128xf32>
    %78 = arith.addf %74, %77 : vector<2x128xf32>
    %79 = vector.extract_strided_slice %78 {offsets = [0, 0], sizes = [2, 32], strides = [1, 1]} : vector<2x128xf32> to vector<2x32xf32>
    %80 = arith.negf %79 : vector<2x32xf32>
    %81 = math.exp %80 : vector<2x32xf32>
    %cst_22 = arith.constant 1.000000e+00 : f32
    %82 = vector.broadcast %cst_22 : f32 to vector<2x32xf32>
    %83 = arith.addf %82, %81 : vector<2x32xf32>
    %84 = arith.divf %82, %83 : vector<2x32xf32>
    %85 = vector.extract_strided_slice %78 {offsets = [0, 32], sizes = [2, 32], strides = [1, 1]} : vector<2x128xf32> to vector<2x32xf32>
    %86 = arith.negf %85 : vector<2x32xf32>
    %87 = math.exp %86 : vector<2x32xf32>
    %cst_23 = arith.constant 1.000000e+00 : f32
    %88 = vector.broadcast %cst_23 : f32 to vector<2x32xf32>
    %89 = arith.addf %88, %87 : vector<2x32xf32>
    %90 = arith.divf %88, %89 : vector<2x32xf32>
    %91 = vector.extract_strided_slice %78 {offsets = [0, 64], sizes = [2, 32], strides = [1, 1]} : vector<2x128xf32> to vector<2x32xf32>
    %92 = math.tanh %91 : vector<2x32xf32>
    %93 = vector.extract_strided_slice %78 {offsets = [0, 96], sizes = [2, 32], strides = [1, 1]} : vector<2x128xf32> to vector<2x32xf32>
    %94 = arith.negf %93 : vector<2x32xf32>
    %95 = math.exp %94 : vector<2x32xf32>
    %cst_24 = arith.constant 1.000000e+00 : f32
    %96 = vector.broadcast %cst_24 : f32 to vector<2x32xf32>
    %97 = arith.addf %96, %95 : vector<2x32xf32>
    %98 = arith.divf %96, %97 : vector<2x32xf32>
    %99 = arith.mulf %90, %41 : vector<2x32xf32>
    %100 = arith.mulf %84, %92 : vector<2x32xf32>
    %101 = arith.addf %99, %100 : vector<2x32xf32>
    %102 = math.tanh %101 : vector<2x32xf32>
    %103 = arith.mulf %98, %102 : vector<2x32xf32>
    %104 = arith.truncf %71 : vector<2x32xf32> to vector<2x32xbf16>
    %cst_25 = arith.constant dense<0.000000e+00> : vector<2x128xf32>
    %105 = tpu.matmul %104, %10, %cst_25 {dimension_numbers = #tpu.dot_dimension_numbers<[1], [0], [0], [1], [0, 0, 1, 1], [], []>} : vector<2x32xbf16>, vector<32x128xbf16>, vector<2x128xf32> -> vector<2x128xf32>
    %106 = arith.addf %75, %105 : vector<2x128xf32>
    %107 = vector.extract_strided_slice %106 {offsets = [0, 0], sizes = [2, 32], strides = [1, 1]} : vector<2x128xf32> to vector<2x32xf32>
    %108 = arith.negf %107 : vector<2x32xf32>
    %109 = math.exp %108 : vector<2x32xf32>
    %cst_26 = arith.constant 1.000000e+00 : f32
    %110 = vector.broadcast %cst_26 : f32 to vector<2x32xf32>
    %111 = arith.addf %110, %109 : vector<2x32xf32>
    %112 = arith.divf %110, %111 : vector<2x32xf32>
    %113 = vector.extract_strided_slice %106 {offsets = [0, 32], sizes = [2, 32], strides = [1, 1]} : vector<2x128xf32> to vector<2x32xf32>
    %114 = arith.negf %113 : vector<2x32xf32>
    %115 = math.exp %114 : vector<2x32xf32>
    %cst_27 = arith.constant 1.000000e+00 : f32
    %116 = vector.broadcast %cst_27 : f32 to vector<2x32xf32>
    %117 = arith.addf %116, %115 : vector<2x32xf32>
    %118 = arith.divf %116, %117 : vector<2x32xf32>
    %119 = vector.extract_strided_slice %106 {offsets = [0, 64], sizes = [2, 32], strides = [1, 1]} : vector<2x128xf32> to vector<2x32xf32>
    %120 = math.tanh %119 : vector<2x32xf32>
    %121 = vector.extract_strided_slice %106 {offsets = [0, 96], sizes = [2, 32], strides = [1, 1]} : vector<2x128xf32> to vector<2x32xf32>
    %122 = arith.negf %121 : vector<2x32xf32>
    %123 = math.exp %122 : vector<2x32xf32>
    %cst_28 = arith.constant 1.000000e+00 : f32
    %124 = vector.broadcast %cst_28 : f32 to vector<2x32xf32>
    %125 = arith.addf %124, %123 : vector<2x32xf32>
    %126 = arith.divf %124, %125 : vector<2x32xf32>
    %127 = arith.mulf %118, %69 : vector<2x32xf32>
    %128 = arith.mulf %112, %120 : vector<2x32xf32>
    %129 = arith.addf %127, %128 : vector<2x32xf32>
    %130 = math.tanh %129 : vector<2x32xf32>
    %131 = arith.mulf %126, %130 : vector<2x32xf32>
    %132 = arith.addf %72, %103 : vector<2x32xf32>
    %133 = arith.addf %73, %131 : vector<2x32xf32>
    %134 = vector.extract_strided_slice %6 {offsets = [4, 0], sizes = [2, 128], strides = [1, 1]} : vector<16x256xf32> to vector<2x128xf32>
    %135 = vector.extract_strided_slice %6 {offsets = [10, 128], sizes = [2, 128], strides = [1, 1]} : vector<16x256xf32> to vector<2x128xf32>
    %136 = arith.truncf %103 : vector<2x32xf32> to vector<2x32xbf16>
    %cst_29 = arith.constant dense<0.000000e+00> : vector<2x128xf32>
    %137 = tpu.matmul %136, %8, %cst_29 {dimension_numbers = #tpu.dot_dimension_numbers<[1], [0], [0], [1], [0, 0, 1, 1], [], []>} : vector<2x32xbf16>, vector<32x128xbf16>, vector<2x128xf32> -> vector<2x128xf32>
    %138 = arith.addf %134, %137 : vector<2x128xf32>
    %139 = vector.extract_strided_slice %138 {offsets = [0, 0], sizes = [2, 32], strides = [1, 1]} : vector<2x128xf32> to vector<2x32xf32>
    %140 = arith.negf %139 : vector<2x32xf32>
    %141 = math.exp %140 : vector<2x32xf32>
    %cst_30 = arith.constant 1.000000e+00 : f32
    %142 = vector.broadcast %cst_30 : f32 to vector<2x32xf32>
    %143 = arith.addf %142, %141 : vector<2x32xf32>
    %144 = arith.divf %142, %143 : vector<2x32xf32>
    %145 = vector.extract_strided_slice %138 {offsets = [0, 32], sizes = [2, 32], strides = [1, 1]} : vector<2x128xf32> to vector<2x32xf32>
    %146 = arith.negf %145 : vector<2x32xf32>
    %147 = math.exp %146 : vector<2x32xf32>
    %cst_31 = arith.constant 1.000000e+00 : f32
    %148 = vector.broadcast %cst_31 : f32 to vector<2x32xf32>
    %149 = arith.addf %148, %147 : vector<2x32xf32>
    %150 = arith.divf %148, %149 : vector<2x32xf32>
    %151 = vector.extract_strided_slice %138 {offsets = [0, 64], sizes = [2, 32], strides = [1, 1]} : vector<2x128xf32> to vector<2x32xf32>
    %152 = math.tanh %151 : vector<2x32xf32>
    %153 = vector.extract_strided_slice %138 {offsets = [0, 96], sizes = [2, 32], strides = [1, 1]} : vector<2x128xf32> to vector<2x32xf32>
    %154 = arith.negf %153 : vector<2x32xf32>
    %155 = math.exp %154 : vector<2x32xf32>
    %cst_32 = arith.constant 1.000000e+00 : f32
    %156 = vector.broadcast %cst_32 : f32 to vector<2x32xf32>
    %157 = arith.addf %156, %155 : vector<2x32xf32>
    %158 = arith.divf %156, %157 : vector<2x32xf32>
    %159 = arith.mulf %150, %101 : vector<2x32xf32>
    %160 = arith.mulf %144, %152 : vector<2x32xf32>
    %161 = arith.addf %159, %160 : vector<2x32xf32>
    %162 = math.tanh %161 : vector<2x32xf32>
    %163 = arith.mulf %158, %162 : vector<2x32xf32>
    %164 = arith.truncf %131 : vector<2x32xf32> to vector<2x32xbf16>
    %cst_33 = arith.constant dense<0.000000e+00> : vector<2x128xf32>
    %165 = tpu.matmul %164, %10, %cst_33 {dimension_numbers = #tpu.dot_dimension_numbers<[1], [0], [0], [1], [0, 0, 1, 1], [], []>} : vector<2x32xbf16>, vector<32x128xbf16>, vector<2x128xf32> -> vector<2x128xf32>
    %166 = arith.addf %135, %165 : vector<2x128xf32>
    %167 = vector.extract_strided_slice %166 {offsets = [0, 0], sizes = [2, 32], strides = [1, 1]} : vector<2x128xf32> to vector<2x32xf32>
    %168 = arith.negf %167 : vector<2x32xf32>
    %169 = math.exp %168 : vector<2x32xf32>
    %cst_34 = arith.constant 1.000000e+00 : f32
    %170 = vector.broadcast %cst_34 : f32 to vector<2x32xf32>
    %171 = arith.addf %170, %169 : vector<2x32xf32>
    %172 = arith.divf %170, %171 : vector<2x32xf32>
    %173 = vector.extract_strided_slice %166 {offsets = [0, 32], sizes = [2, 32], strides = [1, 1]} : vector<2x128xf32> to vector<2x32xf32>
    %174 = arith.negf %173 : vector<2x32xf32>
    %175 = math.exp %174 : vector<2x32xf32>
    %cst_35 = arith.constant 1.000000e+00 : f32
    %176 = vector.broadcast %cst_35 : f32 to vector<2x32xf32>
    %177 = arith.addf %176, %175 : vector<2x32xf32>
    %178 = arith.divf %176, %177 : vector<2x32xf32>
    %179 = vector.extract_strided_slice %166 {offsets = [0, 64], sizes = [2, 32], strides = [1, 1]} : vector<2x128xf32> to vector<2x32xf32>
    %180 = math.tanh %179 : vector<2x32xf32>
    %181 = vector.extract_strided_slice %166 {offsets = [0, 96], sizes = [2, 32], strides = [1, 1]} : vector<2x128xf32> to vector<2x32xf32>
    %182 = arith.negf %181 : vector<2x32xf32>
    %183 = math.exp %182 : vector<2x32xf32>
    %cst_36 = arith.constant 1.000000e+00 : f32
    %184 = vector.broadcast %cst_36 : f32 to vector<2x32xf32>
    %185 = arith.addf %184, %183 : vector<2x32xf32>
    %186 = arith.divf %184, %185 : vector<2x32xf32>
    %187 = arith.mulf %178, %129 : vector<2x32xf32>
    %188 = arith.mulf %172, %180 : vector<2x32xf32>
    %189 = arith.addf %187, %188 : vector<2x32xf32>
    %190 = math.tanh %189 : vector<2x32xf32>
    %191 = arith.mulf %186, %190 : vector<2x32xf32>
    %192 = arith.addf %132, %163 : vector<2x32xf32>
    %193 = arith.addf %133, %191 : vector<2x32xf32>
    %194 = vector.extract_strided_slice %6 {offsets = [6, 0], sizes = [2, 128], strides = [1, 1]} : vector<16x256xf32> to vector<2x128xf32>
    %195 = vector.extract_strided_slice %6 {offsets = [8, 128], sizes = [2, 128], strides = [1, 1]} : vector<16x256xf32> to vector<2x128xf32>
    %196 = arith.truncf %163 : vector<2x32xf32> to vector<2x32xbf16>
    %cst_37 = arith.constant dense<0.000000e+00> : vector<2x128xf32>
    %197 = tpu.matmul %196, %8, %cst_37 {dimension_numbers = #tpu.dot_dimension_numbers<[1], [0], [0], [1], [0, 0, 1, 1], [], []>} : vector<2x32xbf16>, vector<32x128xbf16>, vector<2x128xf32> -> vector<2x128xf32>
    %198 = arith.addf %194, %197 : vector<2x128xf32>
    %199 = vector.extract_strided_slice %198 {offsets = [0, 0], sizes = [2, 32], strides = [1, 1]} : vector<2x128xf32> to vector<2x32xf32>
    %200 = arith.negf %199 : vector<2x32xf32>
    %201 = math.exp %200 : vector<2x32xf32>
    %cst_38 = arith.constant 1.000000e+00 : f32
    %202 = vector.broadcast %cst_38 : f32 to vector<2x32xf32>
    %203 = arith.addf %202, %201 : vector<2x32xf32>
    %204 = arith.divf %202, %203 : vector<2x32xf32>
    %205 = vector.extract_strided_slice %198 {offsets = [0, 32], sizes = [2, 32], strides = [1, 1]} : vector<2x128xf32> to vector<2x32xf32>
    %206 = arith.negf %205 : vector<2x32xf32>
    %207 = math.exp %206 : vector<2x32xf32>
    %cst_39 = arith.constant 1.000000e+00 : f32
    %208 = vector.broadcast %cst_39 : f32 to vector<2x32xf32>
    %209 = arith.addf %208, %207 : vector<2x32xf32>
    %210 = arith.divf %208, %209 : vector<2x32xf32>
    %211 = vector.extract_strided_slice %198 {offsets = [0, 64], sizes = [2, 32], strides = [1, 1]} : vector<2x128xf32> to vector<2x32xf32>
    %212 = math.tanh %211 : vector<2x32xf32>
    %213 = vector.extract_strided_slice %198 {offsets = [0, 96], sizes = [2, 32], strides = [1, 1]} : vector<2x128xf32> to vector<2x32xf32>
    %214 = arith.negf %213 : vector<2x32xf32>
    %215 = math.exp %214 : vector<2x32xf32>
    %cst_40 = arith.constant 1.000000e+00 : f32
    %216 = vector.broadcast %cst_40 : f32 to vector<2x32xf32>
    %217 = arith.addf %216, %215 : vector<2x32xf32>
    %218 = arith.divf %216, %217 : vector<2x32xf32>
    %219 = arith.mulf %210, %161 : vector<2x32xf32>
    %220 = arith.mulf %204, %212 : vector<2x32xf32>
    %221 = arith.addf %219, %220 : vector<2x32xf32>
    %222 = math.tanh %221 : vector<2x32xf32>
    %223 = arith.mulf %218, %222 : vector<2x32xf32>
    %224 = arith.truncf %191 : vector<2x32xf32> to vector<2x32xbf16>
    %cst_41 = arith.constant dense<0.000000e+00> : vector<2x128xf32>
    %225 = tpu.matmul %224, %10, %cst_41 {dimension_numbers = #tpu.dot_dimension_numbers<[1], [0], [0], [1], [0, 0, 1, 1], [], []>} : vector<2x32xbf16>, vector<32x128xbf16>, vector<2x128xf32> -> vector<2x128xf32>
    %226 = arith.addf %195, %225 : vector<2x128xf32>
    %227 = vector.extract_strided_slice %226 {offsets = [0, 0], sizes = [2, 32], strides = [1, 1]} : vector<2x128xf32> to vector<2x32xf32>
    %228 = arith.negf %227 : vector<2x32xf32>
    %229 = math.exp %228 : vector<2x32xf32>
    %cst_42 = arith.constant 1.000000e+00 : f32
    %230 = vector.broadcast %cst_42 : f32 to vector<2x32xf32>
    %231 = arith.addf %230, %229 : vector<2x32xf32>
    %232 = arith.divf %230, %231 : vector<2x32xf32>
    %233 = vector.extract_strided_slice %226 {offsets = [0, 32], sizes = [2, 32], strides = [1, 1]} : vector<2x128xf32> to vector<2x32xf32>
    %234 = arith.negf %233 : vector<2x32xf32>
    %235 = math.exp %234 : vector<2x32xf32>
    %cst_43 = arith.constant 1.000000e+00 : f32
    %236 = vector.broadcast %cst_43 : f32 to vector<2x32xf32>
    %237 = arith.addf %236, %235 : vector<2x32xf32>
    %238 = arith.divf %236, %237 : vector<2x32xf32>
    %239 = vector.extract_strided_slice %226 {offsets = [0, 64], sizes = [2, 32], strides = [1, 1]} : vector<2x128xf32> to vector<2x32xf32>
    %240 = math.tanh %239 : vector<2x32xf32>
    %241 = vector.extract_strided_slice %226 {offsets = [0, 96], sizes = [2, 32], strides = [1, 1]} : vector<2x128xf32> to vector<2x32xf32>
    %242 = arith.negf %241 : vector<2x32xf32>
    %243 = math.exp %242 : vector<2x32xf32>
    %cst_44 = arith.constant 1.000000e+00 : f32
    %244 = vector.broadcast %cst_44 : f32 to vector<2x32xf32>
    %245 = arith.addf %244, %243 : vector<2x32xf32>
    %246 = arith.divf %244, %245 : vector<2x32xf32>
    %247 = arith.mulf %238, %189 : vector<2x32xf32>
    %248 = arith.mulf %232, %240 : vector<2x32xf32>
    %249 = arith.addf %247, %248 : vector<2x32xf32>
    %250 = math.tanh %249 : vector<2x32xf32>
    %251 = arith.mulf %246, %250 : vector<2x32xf32>
    %252 = arith.addf %192, %223 : vector<2x32xf32>
    %253 = arith.addf %193, %251 : vector<2x32xf32>
    %254 = vector.extract_strided_slice %6 {offsets = [8, 0], sizes = [2, 128], strides = [1, 1]} : vector<16x256xf32> to vector<2x128xf32>
    %255 = vector.extract_strided_slice %6 {offsets = [6, 128], sizes = [2, 128], strides = [1, 1]} : vector<16x256xf32> to vector<2x128xf32>
    %256 = arith.truncf %223 : vector<2x32xf32> to vector<2x32xbf16>
    %cst_45 = arith.constant dense<0.000000e+00> : vector<2x128xf32>
    %257 = tpu.matmul %256, %8, %cst_45 {dimension_numbers = #tpu.dot_dimension_numbers<[1], [0], [0], [1], [0, 0, 1, 1], [], []>} : vector<2x32xbf16>, vector<32x128xbf16>, vector<2x128xf32> -> vector<2x128xf32>
    %258 = arith.addf %254, %257 : vector<2x128xf32>
    %259 = vector.extract_strided_slice %258 {offsets = [0, 0], sizes = [2, 32], strides = [1, 1]} : vector<2x128xf32> to vector<2x32xf32>
    %260 = arith.negf %259 : vector<2x32xf32>
    %261 = math.exp %260 : vector<2x32xf32>
    %cst_46 = arith.constant 1.000000e+00 : f32
    %262 = vector.broadcast %cst_46 : f32 to vector<2x32xf32>
    %263 = arith.addf %262, %261 : vector<2x32xf32>
    %264 = arith.divf %262, %263 : vector<2x32xf32>
    %265 = vector.extract_strided_slice %258 {offsets = [0, 32], sizes = [2, 32], strides = [1, 1]} : vector<2x128xf32> to vector<2x32xf32>
    %266 = arith.negf %265 : vector<2x32xf32>
    %267 = math.exp %266 : vector<2x32xf32>
    %cst_47 = arith.constant 1.000000e+00 : f32
    %268 = vector.broadcast %cst_47 : f32 to vector<2x32xf32>
    %269 = arith.addf %268, %267 : vector<2x32xf32>
    %270 = arith.divf %268, %269 : vector<2x32xf32>
    %271 = vector.extract_strided_slice %258 {offsets = [0, 64], sizes = [2, 32], strides = [1, 1]} : vector<2x128xf32> to vector<2x32xf32>
    %272 = math.tanh %271 : vector<2x32xf32>
    %273 = vector.extract_strided_slice %258 {offsets = [0, 96], sizes = [2, 32], strides = [1, 1]} : vector<2x128xf32> to vector<2x32xf32>
    %274 = arith.negf %273 : vector<2x32xf32>
    %275 = math.exp %274 : vector<2x32xf32>
    %cst_48 = arith.constant 1.000000e+00 : f32
    %276 = vector.broadcast %cst_48 : f32 to vector<2x32xf32>
    %277 = arith.addf %276, %275 : vector<2x32xf32>
    %278 = arith.divf %276, %277 : vector<2x32xf32>
    %279 = arith.mulf %270, %221 : vector<2x32xf32>
    %280 = arith.mulf %264, %272 : vector<2x32xf32>
    %281 = arith.addf %279, %280 : vector<2x32xf32>
    %282 = math.tanh %281 : vector<2x32xf32>
    %283 = arith.mulf %278, %282 : vector<2x32xf32>
    %284 = arith.truncf %251 : vector<2x32xf32> to vector<2x32xbf16>
    %cst_49 = arith.constant dense<0.000000e+00> : vector<2x128xf32>
    %285 = tpu.matmul %284, %10, %cst_49 {dimension_numbers = #tpu.dot_dimension_numbers<[1], [0], [0], [1], [0, 0, 1, 1], [], []>} : vector<2x32xbf16>, vector<32x128xbf16>, vector<2x128xf32> -> vector<2x128xf32>
    %286 = arith.addf %255, %285 : vector<2x128xf32>
    %287 = vector.extract_strided_slice %286 {offsets = [0, 0], sizes = [2, 32], strides = [1, 1]} : vector<2x128xf32> to vector<2x32xf32>
    %288 = arith.negf %287 : vector<2x32xf32>
    %289 = math.exp %288 : vector<2x32xf32>
    %cst_50 = arith.constant 1.000000e+00 : f32
    %290 = vector.broadcast %cst_50 : f32 to vector<2x32xf32>
    %291 = arith.addf %290, %289 : vector<2x32xf32>
    %292 = arith.divf %290, %291 : vector<2x32xf32>
    %293 = vector.extract_strided_slice %286 {offsets = [0, 32], sizes = [2, 32], strides = [1, 1]} : vector<2x128xf32> to vector<2x32xf32>
    %294 = arith.negf %293 : vector<2x32xf32>
    %295 = math.exp %294 : vector<2x32xf32>
    %cst_51 = arith.constant 1.000000e+00 : f32
    %296 = vector.broadcast %cst_51 : f32 to vector<2x32xf32>
    %297 = arith.addf %296, %295 : vector<2x32xf32>
    %298 = arith.divf %296, %297 : vector<2x32xf32>
    %299 = vector.extract_strided_slice %286 {offsets = [0, 64], sizes = [2, 32], strides = [1, 1]} : vector<2x128xf32> to vector<2x32xf32>
    %300 = math.tanh %299 : vector<2x32xf32>
    %301 = vector.extract_strided_slice %286 {offsets = [0, 96], sizes = [2, 32], strides = [1, 1]} : vector<2x128xf32> to vector<2x32xf32>
    %302 = arith.negf %301 : vector<2x32xf32>
    %303 = math.exp %302 : vector<2x32xf32>
    %cst_52 = arith.constant 1.000000e+00 : f32
    %304 = vector.broadcast %cst_52 : f32 to vector<2x32xf32>
    %305 = arith.addf %304, %303 : vector<2x32xf32>
    %306 = arith.divf %304, %305 : vector<2x32xf32>
    %307 = arith.mulf %298, %249 : vector<2x32xf32>
    %308 = arith.mulf %292, %300 : vector<2x32xf32>
    %309 = arith.addf %307, %308 : vector<2x32xf32>
    %310 = math.tanh %309 : vector<2x32xf32>
    %311 = arith.mulf %306, %310 : vector<2x32xf32>
    %312 = arith.addf %252, %283 : vector<2x32xf32>
    %313 = arith.addf %253, %311 : vector<2x32xf32>
    %314 = vector.extract_strided_slice %6 {offsets = [10, 0], sizes = [2, 128], strides = [1, 1]} : vector<16x256xf32> to vector<2x128xf32>
    %315 = vector.extract_strided_slice %6 {offsets = [4, 128], sizes = [2, 128], strides = [1, 1]} : vector<16x256xf32> to vector<2x128xf32>
    %316 = arith.truncf %283 : vector<2x32xf32> to vector<2x32xbf16>
    %cst_53 = arith.constant dense<0.000000e+00> : vector<2x128xf32>
    %317 = tpu.matmul %316, %8, %cst_53 {dimension_numbers = #tpu.dot_dimension_numbers<[1], [0], [0], [1], [0, 0, 1, 1], [], []>} : vector<2x32xbf16>, vector<32x128xbf16>, vector<2x128xf32> -> vector<2x128xf32>
    %318 = arith.addf %314, %317 : vector<2x128xf32>
    %319 = vector.extract_strided_slice %318 {offsets = [0, 0], sizes = [2, 32], strides = [1, 1]} : vector<2x128xf32> to vector<2x32xf32>
    %320 = arith.negf %319 : vector<2x32xf32>
    %321 = math.exp %320 : vector<2x32xf32>
    %cst_54 = arith.constant 1.000000e+00 : f32
    %322 = vector.broadcast %cst_54 : f32 to vector<2x32xf32>
    %323 = arith.addf %322, %321 : vector<2x32xf32>
    %324 = arith.divf %322, %323 : vector<2x32xf32>
    %325 = vector.extract_strided_slice %318 {offsets = [0, 32], sizes = [2, 32], strides = [1, 1]} : vector<2x128xf32> to vector<2x32xf32>
    %326 = arith.negf %325 : vector<2x32xf32>
    %327 = math.exp %326 : vector<2x32xf32>
    %cst_55 = arith.constant 1.000000e+00 : f32
    %328 = vector.broadcast %cst_55 : f32 to vector<2x32xf32>
    %329 = arith.addf %328, %327 : vector<2x32xf32>
    %330 = arith.divf %328, %329 : vector<2x32xf32>
    %331 = vector.extract_strided_slice %318 {offsets = [0, 64], sizes = [2, 32], strides = [1, 1]} : vector<2x128xf32> to vector<2x32xf32>
    %332 = math.tanh %331 : vector<2x32xf32>
    %333 = vector.extract_strided_slice %318 {offsets = [0, 96], sizes = [2, 32], strides = [1, 1]} : vector<2x128xf32> to vector<2x32xf32>
    %334 = arith.negf %333 : vector<2x32xf32>
    %335 = math.exp %334 : vector<2x32xf32>
    %cst_56 = arith.constant 1.000000e+00 : f32
    %336 = vector.broadcast %cst_56 : f32 to vector<2x32xf32>
    %337 = arith.addf %336, %335 : vector<2x32xf32>
    %338 = arith.divf %336, %337 : vector<2x32xf32>
    %339 = arith.mulf %330, %281 : vector<2x32xf32>
    %340 = arith.mulf %324, %332 : vector<2x32xf32>
    %341 = arith.addf %339, %340 : vector<2x32xf32>
    %342 = math.tanh %341 : vector<2x32xf32>
    %343 = arith.mulf %338, %342 : vector<2x32xf32>
    %344 = arith.truncf %311 : vector<2x32xf32> to vector<2x32xbf16>
    %cst_57 = arith.constant dense<0.000000e+00> : vector<2x128xf32>
    %345 = tpu.matmul %344, %10, %cst_57 {dimension_numbers = #tpu.dot_dimension_numbers<[1], [0], [0], [1], [0, 0, 1, 1], [], []>} : vector<2x32xbf16>, vector<32x128xbf16>, vector<2x128xf32> -> vector<2x128xf32>
    %346 = arith.addf %315, %345 : vector<2x128xf32>
    %347 = vector.extract_strided_slice %346 {offsets = [0, 0], sizes = [2, 32], strides = [1, 1]} : vector<2x128xf32> to vector<2x32xf32>
    %348 = arith.negf %347 : vector<2x32xf32>
    %349 = math.exp %348 : vector<2x32xf32>
    %cst_58 = arith.constant 1.000000e+00 : f32
    %350 = vector.broadcast %cst_58 : f32 to vector<2x32xf32>
    %351 = arith.addf %350, %349 : vector<2x32xf32>
    %352 = arith.divf %350, %351 : vector<2x32xf32>
    %353 = vector.extract_strided_slice %346 {offsets = [0, 32], sizes = [2, 32], strides = [1, 1]} : vector<2x128xf32> to vector<2x32xf32>
    %354 = arith.negf %353 : vector<2x32xf32>
    %355 = math.exp %354 : vector<2x32xf32>
    %cst_59 = arith.constant 1.000000e+00 : f32
    %356 = vector.broadcast %cst_59 : f32 to vector<2x32xf32>
    %357 = arith.addf %356, %355 : vector<2x32xf32>
    %358 = arith.divf %356, %357 : vector<2x32xf32>
    %359 = vector.extract_strided_slice %346 {offsets = [0, 64], sizes = [2, 32], strides = [1, 1]} : vector<2x128xf32> to vector<2x32xf32>
    %360 = math.tanh %359 : vector<2x32xf32>
    %361 = vector.extract_strided_slice %346 {offsets = [0, 96], sizes = [2, 32], strides = [1, 1]} : vector<2x128xf32> to vector<2x32xf32>
    %362 = arith.negf %361 : vector<2x32xf32>
    %363 = math.exp %362 : vector<2x32xf32>
    %cst_60 = arith.constant 1.000000e+00 : f32
    %364 = vector.broadcast %cst_60 : f32 to vector<2x32xf32>
    %365 = arith.addf %364, %363 : vector<2x32xf32>
    %366 = arith.divf %364, %365 : vector<2x32xf32>
    %367 = arith.mulf %358, %309 : vector<2x32xf32>
    %368 = arith.mulf %352, %360 : vector<2x32xf32>
    %369 = arith.addf %367, %368 : vector<2x32xf32>
    %370 = math.tanh %369 : vector<2x32xf32>
    %371 = arith.mulf %366, %370 : vector<2x32xf32>
    %372 = arith.addf %312, %343 : vector<2x32xf32>
    %373 = arith.addf %313, %371 : vector<2x32xf32>
    %374 = vector.extract_strided_slice %6 {offsets = [12, 0], sizes = [2, 128], strides = [1, 1]} : vector<16x256xf32> to vector<2x128xf32>
    %375 = vector.extract_strided_slice %6 {offsets = [2, 128], sizes = [2, 128], strides = [1, 1]} : vector<16x256xf32> to vector<2x128xf32>
    %376 = arith.truncf %343 : vector<2x32xf32> to vector<2x32xbf16>
    %cst_61 = arith.constant dense<0.000000e+00> : vector<2x128xf32>
    %377 = tpu.matmul %376, %8, %cst_61 {dimension_numbers = #tpu.dot_dimension_numbers<[1], [0], [0], [1], [0, 0, 1, 1], [], []>} : vector<2x32xbf16>, vector<32x128xbf16>, vector<2x128xf32> -> vector<2x128xf32>
    %378 = arith.addf %374, %377 : vector<2x128xf32>
    %379 = vector.extract_strided_slice %378 {offsets = [0, 0], sizes = [2, 32], strides = [1, 1]} : vector<2x128xf32> to vector<2x32xf32>
    %380 = arith.negf %379 : vector<2x32xf32>
    %381 = math.exp %380 : vector<2x32xf32>
    %cst_62 = arith.constant 1.000000e+00 : f32
    %382 = vector.broadcast %cst_62 : f32 to vector<2x32xf32>
    %383 = arith.addf %382, %381 : vector<2x32xf32>
    %384 = arith.divf %382, %383 : vector<2x32xf32>
    %385 = vector.extract_strided_slice %378 {offsets = [0, 32], sizes = [2, 32], strides = [1, 1]} : vector<2x128xf32> to vector<2x32xf32>
    %386 = arith.negf %385 : vector<2x32xf32>
    %387 = math.exp %386 : vector<2x32xf32>
    %cst_63 = arith.constant 1.000000e+00 : f32
    %388 = vector.broadcast %cst_63 : f32 to vector<2x32xf32>
    %389 = arith.addf %388, %387 : vector<2x32xf32>
    %390 = arith.divf %388, %389 : vector<2x32xf32>
    %391 = vector.extract_strided_slice %378 {offsets = [0, 64], sizes = [2, 32], strides = [1, 1]} : vector<2x128xf32> to vector<2x32xf32>
    %392 = math.tanh %391 : vector<2x32xf32>
    %393 = vector.extract_strided_slice %378 {offsets = [0, 96], sizes = [2, 32], strides = [1, 1]} : vector<2x128xf32> to vector<2x32xf32>
    %394 = arith.negf %393 : vector<2x32xf32>
    %395 = math.exp %394 : vector<2x32xf32>
    %cst_64 = arith.constant 1.000000e+00 : f32
    %396 = vector.broadcast %cst_64 : f32 to vector<2x32xf32>
    %397 = arith.addf %396, %395 : vector<2x32xf32>
    %398 = arith.divf %396, %397 : vector<2x32xf32>
    %399 = arith.mulf %390, %341 : vector<2x32xf32>
    %400 = arith.mulf %384, %392 : vector<2x32xf32>
    %401 = arith.addf %399, %400 : vector<2x32xf32>
    %402 = math.tanh %401 : vector<2x32xf32>
    %403 = arith.mulf %398, %402 : vector<2x32xf32>
    %404 = arith.truncf %371 : vector<2x32xf32> to vector<2x32xbf16>
    %cst_65 = arith.constant dense<0.000000e+00> : vector<2x128xf32>
    %405 = tpu.matmul %404, %10, %cst_65 {dimension_numbers = #tpu.dot_dimension_numbers<[1], [0], [0], [1], [0, 0, 1, 1], [], []>} : vector<2x32xbf16>, vector<32x128xbf16>, vector<2x128xf32> -> vector<2x128xf32>
    %406 = arith.addf %375, %405 : vector<2x128xf32>
    %407 = vector.extract_strided_slice %406 {offsets = [0, 0], sizes = [2, 32], strides = [1, 1]} : vector<2x128xf32> to vector<2x32xf32>
    %408 = arith.negf %407 : vector<2x32xf32>
    %409 = math.exp %408 : vector<2x32xf32>
    %cst_66 = arith.constant 1.000000e+00 : f32
    %410 = vector.broadcast %cst_66 : f32 to vector<2x32xf32>
    %411 = arith.addf %410, %409 : vector<2x32xf32>
    %412 = arith.divf %410, %411 : vector<2x32xf32>
    %413 = vector.extract_strided_slice %406 {offsets = [0, 32], sizes = [2, 32], strides = [1, 1]} : vector<2x128xf32> to vector<2x32xf32>
    %414 = arith.negf %413 : vector<2x32xf32>
    %415 = math.exp %414 : vector<2x32xf32>
    %cst_67 = arith.constant 1.000000e+00 : f32
    %416 = vector.broadcast %cst_67 : f32 to vector<2x32xf32>
    %417 = arith.addf %416, %415 : vector<2x32xf32>
    %418 = arith.divf %416, %417 : vector<2x32xf32>
    %419 = vector.extract_strided_slice %406 {offsets = [0, 64], sizes = [2, 32], strides = [1, 1]} : vector<2x128xf32> to vector<2x32xf32>
    %420 = math.tanh %419 : vector<2x32xf32>
    %421 = vector.extract_strided_slice %406 {offsets = [0, 96], sizes = [2, 32], strides = [1, 1]} : vector<2x128xf32> to vector<2x32xf32>
    %422 = arith.negf %421 : vector<2x32xf32>
    %423 = math.exp %422 : vector<2x32xf32>
    %cst_68 = arith.constant 1.000000e+00 : f32
    %424 = vector.broadcast %cst_68 : f32 to vector<2x32xf32>
    %425 = arith.addf %424, %423 : vector<2x32xf32>
    %426 = arith.divf %424, %425 : vector<2x32xf32>
    %427 = arith.mulf %418, %369 : vector<2x32xf32>
    %428 = arith.mulf %412, %420 : vector<2x32xf32>
    %429 = arith.addf %427, %428 : vector<2x32xf32>
    %430 = math.tanh %429 : vector<2x32xf32>
    %431 = arith.mulf %426, %430 : vector<2x32xf32>
    %432 = arith.addf %372, %403 : vector<2x32xf32>
    %433 = arith.addf %373, %431 : vector<2x32xf32>
    %434 = vector.extract_strided_slice %6 {offsets = [14, 0], sizes = [2, 128], strides = [1, 1]} : vector<16x256xf32> to vector<2x128xf32>
    %435 = vector.extract_strided_slice %6 {offsets = [0, 128], sizes = [2, 128], strides = [1, 1]} : vector<16x256xf32> to vector<2x128xf32>
    %436 = arith.truncf %403 : vector<2x32xf32> to vector<2x32xbf16>
    %cst_69 = arith.constant dense<0.000000e+00> : vector<2x128xf32>
    %437 = tpu.matmul %436, %8, %cst_69 {dimension_numbers = #tpu.dot_dimension_numbers<[1], [0], [0], [1], [0, 0, 1, 1], [], []>} : vector<2x32xbf16>, vector<32x128xbf16>, vector<2x128xf32> -> vector<2x128xf32>
    %438 = arith.addf %434, %437 : vector<2x128xf32>
    %439 = vector.extract_strided_slice %438 {offsets = [0, 0], sizes = [2, 32], strides = [1, 1]} : vector<2x128xf32> to vector<2x32xf32>
    %440 = arith.negf %439 : vector<2x32xf32>
    %441 = math.exp %440 : vector<2x32xf32>
    %cst_70 = arith.constant 1.000000e+00 : f32
    %442 = vector.broadcast %cst_70 : f32 to vector<2x32xf32>
    %443 = arith.addf %442, %441 : vector<2x32xf32>
    %444 = arith.divf %442, %443 : vector<2x32xf32>
    %445 = vector.extract_strided_slice %438 {offsets = [0, 32], sizes = [2, 32], strides = [1, 1]} : vector<2x128xf32> to vector<2x32xf32>
    %446 = arith.negf %445 : vector<2x32xf32>
    %447 = math.exp %446 : vector<2x32xf32>
    %cst_71 = arith.constant 1.000000e+00 : f32
    %448 = vector.broadcast %cst_71 : f32 to vector<2x32xf32>
    %449 = arith.addf %448, %447 : vector<2x32xf32>
    %450 = arith.divf %448, %449 : vector<2x32xf32>
    %451 = vector.extract_strided_slice %438 {offsets = [0, 64], sizes = [2, 32], strides = [1, 1]} : vector<2x128xf32> to vector<2x32xf32>
    %452 = math.tanh %451 : vector<2x32xf32>
    %453 = vector.extract_strided_slice %438 {offsets = [0, 96], sizes = [2, 32], strides = [1, 1]} : vector<2x128xf32> to vector<2x32xf32>
    %454 = arith.negf %453 : vector<2x32xf32>
    %455 = math.exp %454 : vector<2x32xf32>
    %cst_72 = arith.constant 1.000000e+00 : f32
    %456 = vector.broadcast %cst_72 : f32 to vector<2x32xf32>
    %457 = arith.addf %456, %455 : vector<2x32xf32>
    %458 = arith.divf %456, %457 : vector<2x32xf32>
    %459 = arith.mulf %450, %401 : vector<2x32xf32>
    %460 = arith.mulf %444, %452 : vector<2x32xf32>
    %461 = arith.addf %459, %460 : vector<2x32xf32>
    %462 = math.tanh %461 : vector<2x32xf32>
    %463 = arith.mulf %458, %462 : vector<2x32xf32>
    %464 = arith.truncf %431 : vector<2x32xf32> to vector<2x32xbf16>
    %cst_73 = arith.constant dense<0.000000e+00> : vector<2x128xf32>
    %465 = tpu.matmul %464, %10, %cst_73 {dimension_numbers = #tpu.dot_dimension_numbers<[1], [0], [0], [1], [0, 0, 1, 1], [], []>} : vector<2x32xbf16>, vector<32x128xbf16>, vector<2x128xf32> -> vector<2x128xf32>
    %466 = arith.addf %435, %465 : vector<2x128xf32>
    %467 = vector.extract_strided_slice %466 {offsets = [0, 0], sizes = [2, 32], strides = [1, 1]} : vector<2x128xf32> to vector<2x32xf32>
    %468 = arith.negf %467 : vector<2x32xf32>
    %469 = math.exp %468 : vector<2x32xf32>
    %cst_74 = arith.constant 1.000000e+00 : f32
    %470 = vector.broadcast %cst_74 : f32 to vector<2x32xf32>
    %471 = arith.addf %470, %469 : vector<2x32xf32>
    %472 = arith.divf %470, %471 : vector<2x32xf32>
    %473 = vector.extract_strided_slice %466 {offsets = [0, 32], sizes = [2, 32], strides = [1, 1]} : vector<2x128xf32> to vector<2x32xf32>
    %474 = arith.negf %473 : vector<2x32xf32>
    %475 = math.exp %474 : vector<2x32xf32>
    %cst_75 = arith.constant 1.000000e+00 : f32
    %476 = vector.broadcast %cst_75 : f32 to vector<2x32xf32>
    %477 = arith.addf %476, %475 : vector<2x32xf32>
    %478 = arith.divf %476, %477 : vector<2x32xf32>
    %479 = vector.extract_strided_slice %466 {offsets = [0, 64], sizes = [2, 32], strides = [1, 1]} : vector<2x128xf32> to vector<2x32xf32>
    %480 = math.tanh %479 : vector<2x32xf32>
    %481 = vector.extract_strided_slice %466 {offsets = [0, 96], sizes = [2, 32], strides = [1, 1]} : vector<2x128xf32> to vector<2x32xf32>
    %482 = arith.negf %481 : vector<2x32xf32>
    %483 = math.exp %482 : vector<2x32xf32>
    %cst_76 = arith.constant 1.000000e+00 : f32
    %484 = vector.broadcast %cst_76 : f32 to vector<2x32xf32>
    %485 = arith.addf %484, %483 : vector<2x32xf32>
    %486 = arith.divf %484, %485 : vector<2x32xf32>
    %487 = arith.mulf %478, %429 : vector<2x32xf32>
    %488 = arith.mulf %472, %480 : vector<2x32xf32>
    %489 = arith.addf %487, %488 : vector<2x32xf32>
    %490 = math.tanh %489 : vector<2x32xf32>
    %491 = arith.mulf %486, %490 : vector<2x32xf32>
    %492 = arith.addf %432, %463 : vector<2x32xf32>
    %493 = arith.addf %433, %491 : vector<2x32xf32>
    %494 = tpu.concatenate %492, %493 in 1 : vector<2x32xf32>, vector<2x32xf32> -> vector<2x64xf32>
    %c0_77 = arith.constant 0 : index
    %c0_78 = arith.constant 0 : index
    %495 = vector.load %arg5[%c0_77, %c0_78] : memref<2x64xf32, #tpu.memory_space<vmem>>, vector<2x64xf32>
    tpu.vector_store %arg5[%c0_77, %c0_78], %494 {strides = array<i32>} : memref<2x64xf32, #tpu.memory_space<vmem>>, vector<2x64xf32>,
    %496 = vector.shape_cast %463 : vector<2x32xf32> to vector<1x2x32xf32>
    %497 = vector.shape_cast %491 : vector<2x32xf32> to vector<1x2x32xf32>
    %498 = tpu.concatenate %496, %497 in 0 : vector<1x2x32xf32>, vector<1x2x32xf32> -> vector<2x2x32xf32>
    %c0_79 = arith.constant 0 : index
    %c0_80 = arith.constant 0 : index
    %c0_81 = arith.constant 0 : index
    %499 = vector.load %arg6[%c0_79, %c0_80, %c0_81] : memref<2x2x32xf32, #tpu.memory_space<vmem>>, vector<2x2x32xf32>
    tpu.vector_store %arg6[%c0_79, %c0_80, %c0_81], %498 {strides = array<i32>} : memref<2x2x32xf32, #tpu.memory_space<vmem>>, vector<2x2x32xf32>,
    %500 = vector.shape_cast %461 : vector<2x32xf32> to vector<1x2x32xf32>
    %501 = vector.shape_cast %489 : vector<2x32xf32> to vector<1x2x32xf32>
    %502 = tpu.concatenate %500, %501 in 0 : vector<1x2x32xf32>, vector<1x2x32xf32> -> vector<2x2x32xf32>
    %c0_82 = arith.constant 0 : index
    %c0_83 = arith.constant 0 : index
    %c0_84 = arith.constant 0 : index
    %503 = vector.load %arg7[%c0_82, %c0_83, %c0_84] : memref<2x2x32xf32, #tpu.memory_space<vmem>>, vector<2x2x32xf32>
    tpu.vector_store %arg7[%c0_82, %c0_83, %c0_84], %502 {strides = array<i32>} : memref<2x2x32xf32, #tpu.memory_space<vmem>>, vector<2x2x32xf32>,
    %504 = vector.shape_cast %43 : vector<2x32xf32> to vector<1x2x32xf32>
    %505 = vector.shape_cast %103 : vector<2x32xf32> to vector<1x2x32xf32>
    %506 = vector.shape_cast %163 : vector<2x32xf32> to vector<1x2x32xf32>
    %507 = vector.shape_cast %223 : vector<2x32xf32> to vector<1x2x32xf32>
    %508 = vector.shape_cast %283 : vector<2x32xf32> to vector<1x2x32xf32>
    %509 = vector.shape_cast %343 : vector<2x32xf32> to vector<1x2x32xf32>
    %510 = vector.shape_cast %403 : vector<2x32xf32> to vector<1x2x32xf32>
    %511 = vector.shape_cast %463 : vector<2x32xf32> to vector<1x2x32xf32>
    %512 = tpu.concatenate %504, %505, %506, %507, %508, %509, %510, %511 in 0 : vector<1x2x32xf32>, vector<1x2x32xf32>, vector<1x2x32xf32>, vector<1x2x32xf32>, vector<1x2x32xf32>, vector<1x2x32xf32>, vector<1x2x32xf32>, vector<1x2x32xf32> -> vector<8x2x32xf32>
    %513 = vector.shape_cast %491 : vector<2x32xf32> to vector<1x2x32xf32>
    %514 = vector.shape_cast %431 : vector<2x32xf32> to vector<1x2x32xf32>
    %515 = vector.shape_cast %371 : vector<2x32xf32> to vector<1x2x32xf32>
    %516 = vector.shape_cast %311 : vector<2x32xf32> to vector<1x2x32xf32>
    %517 = vector.shape_cast %251 : vector<2x32xf32> to vector<1x2x32xf32>
    %518 = vector.shape_cast %191 : vector<2x32xf32> to vector<1x2x32xf32>
    %519 = vector.shape_cast %131 : vector<2x32xf32> to vector<1x2x32xf32>
    %520 = vector.shape_cast %71 : vector<2x32xf32> to vector<1x2x32xf32>
    %521 = tpu.concatenate %513, %514, %515, %516, %517, %518, %519, %520 in 0 : vector<1x2x32xf32>, vector<1x2x32xf32>, vector<1x2x32xf32>, vector<1x2x32xf32>, vector<1x2x32xf32>, vector<1x2x32xf32>, vector<1x2x32xf32>, vector<1x2x32xf32> -> vector<8x2x32xf32>
    %522 = tpu.concatenate %512, %521 in 2 : vector<8x2x32xf32>, vector<8x2x32xf32> -> vector<8x2x64xf32>
    %c0_85 = arith.constant 0 : index
    %c0_86 = arith.constant 0 : index
    %c0_87 = arith.constant 0 : index
    %523 = vector.load %arg4[%c0_85, %c0_86, %c0_87] : memref<8x2x64xf32, #tpu.memory_space<vmem>>, vector<8x2x64xf32>
    tpu.vector_store %arg4[%c0_85, %c0_86, %c0_87], %522 {strides = array<i32>} : memref<8x2x64xf32, #tpu.memory_space<vmem>>, vector<8x2x64xf32>,
    return
  }
}

</mosaic_0001>

<bundles_post_ra>
// kernel: tpu_custom_call.1
= control target key start
LH: loop header
LB: loop body
LE: loop exit
PB: predicated region body
PF: predicated region fallthrough
CT: control target
= control target key end

     0   :  { %13 = vsyncpa [#allocation3], 0  ;;  %s2646_s0 = inlined_call_operand.hbm [shape: f32[16,16], index: 0, kind: input, shape index: {}]   ;;  %s2647_s1 = inlined_call_operand.hbm [shape: bf16[16,256], index: 1, kind: input, shape index: {}]   ;;  %s2648_s2 = inlined_call_operand.hbm [shape: bf16[2,32,128], index: 2, kind: input, shape index: {}]   ;;  %s2649_s3 = inlined_call_operand.vmem [shape: f32[1,256], index: 3, kind: input, shape index: {}]   ;;  %s2650_s4 = inlined_call_operand.hbm [shape: f32[8,2,64], index: 4, kind: output, shape index: {0}]   ;;  %s2651_s5 = inlined_call_operand.hbm [shape: f32[2,64], index: 5, kind: output, shape index: {1}]   ;;  %s2652_s6 = inlined_call_operand.hbm [shape: f32[2,2,32], index: 6, kind: output, shape index: {2}]   ;;  %s2653_s7 = inlined_call_operand.hbm [shape: f32[2,2,32], index: 7, kind: output, shape index: {3}]  }
   0x1   :  { %14 = vsyncpa [#allocation6], 0 }
   0x2   :  { %15 = vsyncpa [#allocation4], 0 }
   0x3   :  { %16 = vsyncpa [#allocation10], 0 }
   0x4   :  { %17 = vsyncpa [#allocation13], 0  ;;  %s2140_s24 = smov [#allocation5]   ;;  %s2141_s26 = smov [#allocation2]  }
   0x5   :  { %s35_s25 = sshll.u32 %s2140_s24, 4  ;;  %s23_s27 = sshll.u32 %s2141_s26, 4  ;;  %s36_s25 = int_to_ptr.vmem [resolvable:$true] %s35_s25  ;;  %s24_s27 = int_to_ptr.vmem [resolvable:$true] %s23_s27 }
   0x6   :  { %s1998_s28 = scalar_lea.vmem %s36_s25, 256  ;;  %p2003_p1 = scmp.lt.s32.totalorder %s36_s25, %s36_s25 }
   0x7   :  { %p1999_p0 = scmp.ne.s32.totalorder %s36_s25, %s1998_s28  ;;  %p2004_p2 = scmp.lt.s32.totalorder %s1998_s28, %s1998_s28 }
   0x9   :  { %p2005_p3 = por %p2004_p2, %p2003_p1 }
   0xb   :  { %p2006_p4 = pnand %p2005_p3, %p1999_p0 }
   0xd   :  { %2009 = shalt.err (!%p2006_p4)
}
   0xe   :  { %s2142_s29 = smov 128   ;;  %s2143_s30 = smov 8  }
   0xf   :  { %41 = dma.hbm_to_vmem [thread:$0]  %s2647_s1, 256, %s36_s25, [#allocation6], %s2142_s29, %s2142_s29, %s2143_s30  }
  0x10   :  { %s2018_s10 = scalar_lea.vmem %s24_s27, 256  ;;  %p2023_p6 = scmp.lt.s32.totalorder %s24_s27, %s24_s27 }
  0x11   :  { %p2019_p5 = scmp.ne.s32.totalorder %s24_s27, %s2018_s10  ;;  %p2024_p7 = scmp.lt.s32.totalorder %s2018_s10, %s2018_s10 }
  0x13   :  { %p2025_p8 = por %p2024_p7, %p2023_p6 }
  0x15   :  { %p2026_p9 = pnand %p2025_p8, %p2019_p5 }
  0x17   :  { %2029 = shalt.err (!%p2026_p9)
}
  0x18   :  { %29 = dma.hbm_to_vmem [thread:$0]  %s2646_s0, 256, %s24_s27, [#allocation3], %s2142_s29, %s2142_s29, %s2143_s30  }
  0x19   :  { %s2144_s13 = smov [#allocation7]  }
  0x1a   :  { %s47_s14 = sshll.u32 %s2144_s13, 4  ;;  %s48_s14 = int_to_ptr.vmem [resolvable:$true] %s47_s14 }
  0x1b   :  { %s2038_s15 = scalar_lea.vmem %s48_s14, 512  ;;  %p2043_p11 = scmp.lt.s32.totalorder %s48_s14, %s48_s14 }
  0x1c   :  { %p2039_p10 = scmp.ne.s32.totalorder %s48_s14, %s2038_s15  ;;  %p2044_p12 = scmp.lt.s32.totalorder %s2038_s15, %s2038_s15 }
  0x1e   :  { %p2045_p13 = por %p2044_p12, %p2043_p11 }
  0x20   :  { %p2046_p0 = pnand %p2045_p13, %p2039_p10 }
  0x22   :  { %2049 = shalt.err (!%p2046_p0)
}
  0x23   :  { %s2145_s1 = smov 64   ;;  %s2146_s16 = smov 4  }
  0x24   :  { %53 = dma.hbm_to_vmem [thread:$0]  %s2648_s2, 512, %s48_s14, [#allocation6], %s2145_s1, %s2145_s1, %s2146_s16  }
  0x25   :  { %2130 = dma.done.wait [#allocation3], 256  }
  0x26   :  { %2131 = vsyncadd [#allocation3], 4294967040 }
  0x27   :  { %2132 = dma.done.wait [#allocation6], 768  }
  0x28   :  { %2133 = vsyncadd [#allocation6], 4294966528  ;;  %v2147_v0 = vmov 0.0   ;;  %v2148_v1 = vmov 0   ;;  %vm2149_vm0 = vmmov 0   ;;  %v2211_v3 = vld [vmem:[#allocation7 + $0x8] sm:$0xff]   ;;  %v73_v11 = vlaneseq }
  0x29   :  { %1710 = vmatprep.subr.bf16.mxu1 %v2147_v0  ;;  %129 = vmatprep.mubr.bf16.mxu0 %v2148_v1  ;;  %v1855_v2 = vld [vmem:[#allocation5 + $0x4] ss:$8 sps:$4 sm:$0xff]   ;;  %v1858_v4 = vld [vmem:[#allocation5] ss:$8 sps:$4 sm:$0xff]   ;;  %v66_v5 = vld [vmem:[#allocation2] sm:$0xff]  ;;  %vm93_vm1 = vcmask 130048  }
  0x2a   :  { %1714 = vmatprep.mubr.msk.bf16.mxu1 %vm2149_vm0, %v2147_v0  ;;  %111 = vmatprep.subr.bf16.mxu0 %v1855_v2  ;;  %v67_v6 = vld [vmem:[#allocation2 + $0x8] sm:$0xff]  ;;  %v2214_v8 = vld [vmem:[#allocation7] sm:$0xff]   ;;  %v2217_v9 = vld [vmem:[#allocation7 + $0x18] sm:$0xff]   ;;  %v74_v12 = vshrl.u32 %v73_v11, 7  ;;  %vm161_vm2 = vcmask 261120   ;;  %vm1466_vm3 = vcmask 517120  }
  0x2b   :  { %1711 = vmatpush3.bf16.msra.mxu1 %v2211_v3  ;;  %v68_v7 = vpack.c.bf16 %v67_v6, %v66_v5  ;;  %112 = vmatpush1.bf16.msra.mxu0 %v1858_v4  ;;  %v2222_v10 = vld [vmem:[#allocation7 + $0x10] sm:$0xff]   ;;  %v71_v14 = vld [vmem:[%s2649_s3] sm:$0x3]  ;;  %s2150_s3 = smov 32   ;;  %s2151_s19 = smov 96   ;;  %vm1474_vm4 = vcmask 261126  }
  0x2c   :  { %1712 = vmatprep.subr.bf16.mxu1 %v2147_v0  ;;  %1718 = vmatprep.subr.bf16.mxu0 %v2147_v0  ;;  %v79_v13 = vsub.s32 1, %v74_v12  ;;  %v75_v15 = vsub.s32 0, %v74_v12  ;;  %s2152_s20 = smov [#allocation8]   ;;  %s2153_s22 = smov [#allocation9]  }
  0x2d   :  { %s1567_s21 = sshll.u32 %s2152_s20, 4  ;;  %s1580_s23 = sshll.u32 %s2153_s22, 4  ;;  %s1568_s21 = int_to_ptr.vmem [resolvable:$true] %s1567_s21  ;;  %s1581_s23 = int_to_ptr.vmem [resolvable:$true] %s1580_s23 }
  0x2e   :  { %1627 = vmatmul.mubr.msk.bf16.vlgmr.msra.gmra.mxu0 %vm93_vm1, %v68_v7  ;;  %v80_v16 = vrot.slane %v71_v14, %v79_v13  ;;  %v76_v19 = vrot.slane %v71_v14, %v75_v15  ;;  %s2154_s24 = smov [#allocation11]   ;;  %s2155_s26 = smov [#allocation12]  }
  0x2f   :  { %1713 = vmatpush3.bf16.msra.mxu1 %v2214_v8  ;;  %1719 = vmatpush3.bf16.msra.mxu0 %v2217_v9  ;;  %s1589_s25 = sshll.u32 %s2154_s24, 4  ;;  %s1601_s27 = sshll.u32 %s2155_s26, 4  ;;  %s2607_s25 = int_to_ptr.vmem [resolvable:$true] %s1589_s25  ;;  %s2617_s27 = int_to_ptr.vmem [resolvable:$true] %s1601_s27 }
  0x30   :  { %1722 = vmatprep.mubr.msk.bf16.mxu0 %vm2149_vm0, %v2147_v0  ;;  %1720 = vmatprep.subr.bf16.mxu0 %v2147_v0  ;;  %s2050_s28 = scalar_lea.vmem %s1568_s21, 256  ;;  %p2055_p2 = scmp.lt.s32.totalorder %s1568_s21, %s1568_s21 }
  0x31   :  { %1726 = vmatprep.subr.bf16.mxu1 %v2147_v0  ;;  %p2051_p1 = scmp.ne.s32.totalorder %s1568_s21, %s2050_s28  ;;  %p2056_p3 = scmp.lt.s32.totalorder %s2050_s28, %s2050_s28 }
  0x32   :  { %1715 = vmatmul.mubr.bf16.vlgmr.msra.gmra.mxu1 %v2148_v1 }
  0x33   :  { %1727 = vmatpush3.bf16.msra.mxu1 %v2211_v3  ;;  %1730 = vmatprep.mubr.msk.bf16.mxu1 %vm2149_vm0, %v2147_v0  ;;  %p2057_p4 = por %p2056_p3, %p2055_p2 }
  0x34   :  { %1721 = vmatpush3.bf16.msra.mxu0 %v2222_v10  ;;  %1728 = vmatprep.subr.bf16.mxu1 %v2147_v0 }
  0x35   :  { %1734 = vmatprep.subr.bf16.mxu0 %v2147_v0  ;;  %p2058_p5 = pnand %p2057_p4, %p2051_p1 }
  0x37   :  { %1723 = vmatmul.mubr.bf16.vlgmr.msra.gmra.mxu0 %v2148_v1  ;;  %1729 = vmatpush3.bf16.msra.mxu1 %v2214_v8 }
  0x38   :  { %1735 = vmatpush3.bf16.msra.mxu0 %v2217_v9  ;;  %1738 = vmatprep.mubr.msk.bf16.mxu0 %vm2149_vm0, %v2147_v0 }
  0x39   :  { %1736 = vmatprep.subr.bf16.mxu0 %v2147_v0  ;;  %1742 = vmatprep.subr.bf16.mxu1 %v2147_v0 }
  0x3c   :  { %1737 = vmatpush3.bf16.msra.mxu0 %v2222_v10 }
  0x3d   :  { %1750 = vmatprep.subr.bf16.mxu0 %v2147_v0 }
  0xee   :  { %v131_v17 = vpop.f32.mrf.mxu0 }
  0xef   :  { %v2249_v28 = vadd.f32 %v131_v17, %v76_v19 }
  0xf0   :  { %v133_v18 = vpop.f32.mrf.mxu0 }
  0xf1   :  { %v2245_v20 = vadd.f32 %v133_v18, %v80_v16 }
  0xf2   :  { %v199_v21 = vpop.f32.mrf.mxu1  ;;  %v135_v22 = vpop.f32.mrf.mxu0 }
  0xf3   :  { %v2247_v23 = vadd.f32 %v135_v22, %v76_v19  ;;  %v205_v35 = vadd.f32 %v199_v21, %v2249_v28 }
  0xf4   :  { %v1716_v24 = vpop.f32.mrf.mxu1  ;;  %v137_v25 = vpop.f32.mrf.mxu0 }
  0xf5   :  { %v2251_v29 = vadd.f32 %v137_v25, %v80_v16  ;;  %v1630_v40 = vmul.f32 -1.442695, %v205_v35 }
  0xf6   :  { %v202_v26 = vpop.f32.mrf.mxu1 }
  0xf7   :  { %v276_v27 = vpop.f32.mrf.mxu0 }
  0xf8   :  { %v283_v30 = vrot.slane %v276_v27, 2  ;;  %v1717_v31 = vpop.f32.mrf.mxu1 }
  0xf9   :  { %v1724_v32 = vpop.f32.mrf.mxu0 }
  0xfa   :  { %v285_v33 = vadd.f32 %v283_v30, %v2251_v29 }
  0xfb   :  { %v279_v34 = vpop.f32.mrf.mxu0 }
  0xfc   :  { %1862 = vtanh.f32 %v285_v33  ;;  %v1633_v39 = vmul.f32 -1.442695, %v285_v33 }
  0xfd   :  { %v1725_v36 = vpop.f32.mrf.mxu0  ;;  %1864 = vtanh.f32 %v205_v35 }
  0xfe   :  { %1866 = vpow2.f32 %v1633_v39 }
  0xff   :  { %1868 = vpow2.f32 %v1630_v40 }
 0x109   :  { %v1863_v37 = vpop.eup %1862 }
 0x10a   :  { %295 = vrot.lane.b32.xlu0 %v1863_v37, %s2145_s1  ;;  %v1865_v38 = vpop.eup %1864 }
 0x10b   :  { %v1867_v41 = vpop.eup %1866 }
 0x10c   :  { %v289_v42 = vadd.f32 1.0, %v1867_v41  ;;  %v1869_v43 = vpop.eup %1868 }
 0x10d   :  { %v209_v44 = vadd.f32 1.0, %v1869_v43 }
 0x10e   :  { %215 = vrot.lane.b32.xlu0 %v1865_v38, %s2145_s1  ;;  %1870 = vrcp.f32 %v289_v42 }
 0x10f   :  { %1872 = vrcp.f32 %v209_v44 }
 0x11b   :  { %v1871_v45 = vpop.eup %1870 }
 0x11c   :  { %v1873_v48 = vpop.eup %1872  ;;  %v293_v51 = vmul.f32 0.0, %v1871_v45 }
 0x11d   :  { %v213_v54 = vmul.f32 0.0, %v1873_v48 }
 0x17c   :  { %v296_v46 = vpop.permute.xlu0 %295 }
 0x17d   :  { %v298_v47 = vmul.f32 %v1871_v45, %v296_v46 }
 0x17f   :  { %300 = vrot.lane.b32.xlu1 %v298_v47, %s2150_s3 }
 0x180   :  { %v216_v49 = vpop.permute.xlu0 %215 }
 0x181   :  { %v218_v50 = vmul.f32 %v1873_v48, %v216_v49 }
 0x183   :  { %220 = vrot.lane.b32.xlu1 %v218_v50, %s2150_s3 }
 0x1f1   :  { %v301_v52 = vpop.permute.xlu1 %300 }
 0x1f2   :  { %v2259_v53 = vadd.f32 %v301_v52, %v293_v51 }
 0x1f4   :  { %1874 = vtanh.f32 %v2259_v53  ;;  %v450_v39 = vrot.slane %v2259_v53, 2 }
 0x1f5   :  { %v221_v55 = vpop.permute.xlu1 %220 }
 0x1f6   :  { %v2262_v56 = vadd.f32 %v221_v55, %v213_v54 }
 0x1f8   :  { %1876 = vtanh.f32 %v2262_v56  ;;  %v371_v41 = vrot.slane %v2262_v56, 6 }
 0x201   :  { %v1875_v57 = vpop.eup %1874 }
 0x202   :  { %306 = vrot.lane.b32.xlu0 %v1875_v57, %s2145_s1 }
 0x205   :  { %v1877_v58 = vpop.eup %1876 }
 0x206   :  { %226 = vrot.lane.b32.xlu1 %v1877_v58, %s2145_s1 }
 0x274   :  { %v307_v59 = vpop.permute.xlu0 %306 }
 0x275   :  { %v2267_v60 = vmul.f32 %v1871_v45, %v307_v59 }
 0x277   :  { %v390_v61 = vpack.c.bf16 %v2267_v60, %v2267_v60 }
 0x278   :  { %v227_v62 = vpop.permute.xlu1 %226 }
 0x279   :  { %v2271_v63 = vmul.f32 %v1873_v48, %v227_v62  ;;  %v392_v1 = vrot.slane %v390_v61, 3 }
 0x27b   :  { %393 = vrot.lane.b32.xlu1 %v392_v1, %s2150_s3  ;;  %v312_v2 = vpack.c.bf16 %v2271_v63, %v2271_v63 }
 0x27d   :  { %314 = vrot.lane.b32.xlu0 %v312_v2, %s2150_s3 }
 0x2ed   :  { %v394_v4 = vpop.permute.xlu1 %393 }
 0x2ee   :  { %1739 = vmatmul.mubr.msk.bf16.vlgmr.msra.gmra.mxu0 %vm161_vm2, %v394_v4 }
 0x2ef   :  { %v315_v5 = vpop.permute.xlu0 %314  ;;  %1751 = vmatpush3.bf16.msra.mxu0 %v2217_v9  ;;  %1754 = vmatprep.mubr.msk.bf16.mxu0 %vm2149_vm0, %v2147_v0 }
 0x2f0   :  { %1731 = vmatmul.mubr.msk.bf16.vlgmr.msra.gmra.mxu1 %vm161_vm2, %v315_v5  ;;  %1752 = vmatprep.subr.bf16.mxu0 %v2147_v0 }
 0x2f1   :  { %1743 = vmatpush3.bf16.msra.mxu1 %v2211_v3  ;;  %1746 = vmatprep.mubr.msk.bf16.mxu1 %vm2149_vm0, %v2147_v0 }
 0x2f2   :  { %1744 = vmatprep.subr.bf16.mxu1 %v2147_v0 }
 0x2f3   :  { %1753 = vmatpush3.bf16.msra.mxu0 %v2222_v10 }
 0x2f4   :  { %1766 = vmatprep.subr.bf16.mxu0 %v2147_v0 }
 0x2f5   :  { %1745 = vmatpush3.bf16.msra.mxu1 %v2214_v8 }
 0x2f6   :  { %1758 = vmatprep.subr.bf16.mxu1 %v2147_v0 }
 0x3ae   :  { %v432_v6 = vpop.f32.mrf.mxu0 }
 0x3af   :  { %v439_v7 = vrot.slane %v432_v6, 4 }
 0x3b0   :  { %v353_v11 = vpop.f32.mrf.mxu1  ;;  %v1740_v12 = vpop.f32.mrf.mxu0 }
 0x3b1   :  { %v441_v13 = vadd.f32 %v439_v7, %v2251_v29  ;;  %v360_v14 = vrot.slane %v353_v11, 6 }
 0x3b2   :  { %v1732_v15 = vpop.f32.mrf.mxu1  ;;  %v435_v16 = vpop.f32.mrf.mxu0 }
 0x3b3   :  { %1878 = vtanh.f32 %v441_v13  ;;  %v362_v17 = vadd.f32 %v360_v14, %v2249_v28  ;;  %v1637_v25 = vmul.f32 -1.442695, %v441_v13 }
 0x3b4   :  { %v356_v18 = vpop.f32.mrf.mxu1  ;;  %v1741_v19 = vpop.f32.mrf.mxu0 }
 0x3b5   :  { %1880 = vtanh.f32 %v362_v17  ;;  %v1635_v26 = vmul.f32 -1.442695, %v362_v17 }
 0x3b6   :  { %v1733_v21 = vpop.f32.mrf.mxu1  ;;  %1882 = vpow2.f32 %v1637_v25 }
 0x3b7   :  { %1884 = vpow2.f32 %v1635_v26 }
 0x3c0   :  { %v1879_v22 = vpop.eup %1878 }
 0x3c1   :  { %454 = vrot.lane.b32.xlu1 %v1879_v22, %s2145_s1 }
 0x3c2   :  { %v1881_v24 = vpop.eup %1880 }
 0x3c3   :  { %375 = vrot.lane.b32.xlu0 %v1881_v24, %s2145_s1  ;;  %v1883_v27 = vpop.eup %1882 }
 0x3c4   :  { %v1885_v30 = vpop.eup %1884  ;;  %v445_v31 = vadd.f32 1.0, %v1883_v27 }
 0x3c5   :  { %v366_v32 = vadd.f32 1.0, %v1885_v30 }
 0x3c6   :  { %1886 = vrcp.f32 %v445_v31 }
 0x3c7   :  { %1888 = vrcp.f32 %v366_v32 }
 0x3d3   :  { %v1887_v33 = vpop.eup %1886 }
 0x3d4   :  { %v1889_v36 = vpop.eup %1888  ;;  %v452_v40 = vmul.f32 %v1887_v33, %v450_v39 }
 0x3d5   :  { %v373_v44 = vmul.f32 %v1889_v36, %v371_v41 }
 0x433   :  { %v455_v34 = vpop.permute.xlu1 %454 }
 0x434   :  { %v457_v35 = vmul.f32 %v1887_v33, %v455_v34 }
 0x435   :  { %v376_v37 = vpop.permute.xlu0 %375 }
 0x436   :  { %459 = vrot.lane.b32.xlu1 %v457_v35, %s2150_s3  ;;  %v378_v38 = vmul.f32 %v1889_v36, %v376_v37 }
 0x438   :  { %380 = vrot.lane.b32.xlu0 %v378_v38, %s2150_s3 }
 0x4a8   :  { %v460_v42 = vpop.permute.xlu1 %459 }
 0x4a9   :  { %v2299_v43 = vadd.f32 %v460_v42, %v452_v40 }
 0x4aa   :  { %v381_v45 = vpop.permute.xlu0 %380 }
 0x4ab   :  { %1890 = vtanh.f32 %v2299_v43  ;;  %v2302_v46 = vadd.f32 %v381_v45, %v373_v44  ;;  %v616_v32 = vrot.slane %v2299_v43, 2 }
 0x4ad   :  { %1892 = vtanh.f32 %v2302_v46  ;;  %v537_v34 = vrot.slane %v2302_v46, 6 }
 0x4b8   :  { %v1891_v47 = vpop.eup %1890 }
 0x4b9   :  { %465 = vrot.lane.b32.xlu1 %v1891_v47, %s2145_s1 }
 0x4ba   :  { %v1893_v48 = vpop.eup %1892 }
 0x4bb   :  { %386 = vrot.lane.b32.xlu0 %v1893_v48, %s2145_s1 }
 0x52b   :  { %v466_v49 = vpop.permute.xlu1 %465 }
 0x52c   :  { %v2307_v50 = vmul.f32 %v1887_v33, %v466_v49 }
 0x52d   :  { %v387_v51 = vpop.permute.xlu0 %386 }
 0x52e   :  { %v556_v52 = vpack.c.bf16 %v2307_v50, %v2307_v50  ;;  %v2311_v53 = vmul.f32 %v1889_v36, %v387_v51  ;;  %v474_v42 = vrot.slane %v2307_v50, 6 }
 0x530   :  { %v558_v54 = vrot.slane %v556_v52, 2  ;;  %v477_v55 = vpack.c.bf16 %v2311_v53, %v2311_v53  ;;  %v476_v45 = vadd.f32 %v474_v42, %v2267_v60 }
 0x532   :  { %559 = vrot.lane.b32.xlu1 %v558_v54, %s2150_s3  ;;  %v479_v56 = vrot.slane %v477_v55, 1 }
 0x534   :  { %480 = vrot.lane.b32.xlu0 %v479_v56, %s2150_s3 }
 0x5a4   :  { %v560_v57 = vpop.permute.xlu1 %559 }
 0x5a5   :  { %1755 = vmatmul.mubr.msk.bf16.vlgmr.msra.gmra.mxu0 %vm161_vm2, %v560_v57 }
 0x5a6   :  { %1767 = vmatpush3.bf16.msra.mxu0 %v2217_v9  ;;  %1770 = vmatprep.mubr.msk.bf16.mxu0 %vm2149_vm0, %v2147_v0  ;;  %v481_v58 = vpop.permute.xlu0 %480 }
 0x5a7   :  { %1768 = vmatprep.subr.bf16.mxu0 %v2147_v0  ;;  %1747 = vmatmul.mubr.msk.bf16.vlgmr.msra.gmra.mxu1 %vm161_vm2, %v481_v58 }
 0x5a8   :  { %1759 = vmatpush3.bf16.msra.mxu1 %v2211_v3  ;;  %1762 = vmatprep.mubr.msk.bf16.mxu1 %vm2149_vm0, %v2147_v0 }
 0x5a9   :  { %1760 = vmatprep.subr.bf16.mxu1 %v2147_v0 }
 0x5aa   :  { %1769 = vmatpush3.bf16.msra.mxu0 %v2222_v10 }
 0x5ab   :  { %1782 = vmatprep.subr.bf16.mxu0 %v2147_v0 }
 0x5ac   :  { %1761 = vmatpush3.bf16.msra.mxu1 %v2214_v8 }
 0x5ad   :  { %1774 = vmatprep.subr.bf16.mxu1 %v2147_v0 }
 0x665   :  { %v598_v59 = vpop.f32.mrf.mxu0 }
 0x666   :  { %v605_v61 = vrot.slane %v598_v59, 6 }
 0x667   :  { %v1756_v62 = vpop.f32.mrf.mxu0  ;;  %v519_v2 = vpop.f32.mrf.mxu1 }
 0x668   :  { %v607_v1 = vadd.f32 %v605_v61, %v2251_v29  ;;  %v526_v4 = vrot.slane %v519_v2, 4 }
 0x669   :  { %v601_v5 = vpop.f32.mrf.mxu0  ;;  %v1748_v6 = vpop.f32.mrf.mxu1 }
 0x66a   :  { %1894 = vtanh.f32 %v607_v1  ;;  %v528_v7 = vadd.f32 %v526_v4, %v2249_v28  ;;  %v1641_v16 = vmul.f32 -1.442695, %v607_v1 }
 0x66b   :  { %v1757_v11 = vpop.f32.mrf.mxu0  ;;  %v522_v12 = vpop.f32.mrf.mxu1 }
 0x66c   :  { %1896 = vtanh.f32 %v528_v7  ;;  %v1639_v17 = vmul.f32 -1.442695, %v528_v7 }
 0x66d   :  { %v1749_v13 = vpop.f32.mrf.mxu1  ;;  %1898 = vpow2.f32 %v1641_v16 }
 0x66e   :  { %1900 = vpow2.f32 %v1639_v17 }
 0x677   :  { %v1895_v14 = vpop.eup %1894 }
 0x678   :  { %620 = vrot.lane.b32.xlu1 %v1895_v14, %s2145_s1 }
 0x679   :  { %v1897_v15 = vpop.eup %1896 }
 0x67a   :  { %541 = vrot.lane.b32.xlu0 %v1897_v15, %s2145_s1  ;;  %v1899_v18 = vpop.eup %1898 }
 0x67b   :  { %v1901_v19 = vpop.eup %1900  ;;  %v611_v21 = vadd.f32 1.0, %v1899_v18 }
 0x67c   :  { %v532_v22 = vadd.f32 1.0, %v1901_v19 }
 0x67d   :  { %1902 = vrcp.f32 %v611_v21 }
 0x67e   :  { %1904 = vrcp.f32 %v532_v22 }
 0x68a   :  { %v1903_v24 = vpop.eup %1902 }
 0x68b   :  { %v1905_v27 = vpop.eup %1904  ;;  %v618_v33 = vmul.f32 %v1903_v24, %v616_v32 }
 0x68c   :  { %v539_v37 = vmul.f32 %v1905_v27, %v537_v34 }
 0x6ea   :  { %v621_v25 = vpop.permute.xlu1 %620 }
 0x6eb   :  { %v623_v26 = vmul.f32 %v1903_v24, %v621_v25 }
 0x6ec   :  { %v542_v30 = vpop.permute.xlu0 %541 }
 0x6ed   :  { %625 = vrot.lane.b32.xlu1 %v623_v26, %s2150_s3  ;;  %v544_v31 = vmul.f32 %v1905_v27, %v542_v30 }
 0x6ef   :  { %546 = vrot.lane.b32.xlu0 %v544_v31, %s2150_s3 }
 0x75f   :  { %v626_v35 = vpop.permute.xlu1 %625 }
 0x760   :  { %v2339_v36 = vadd.f32 %v626_v35, %v618_v33 }
 0x761   :  { %v547_v38 = vpop.permute.xlu0 %546 }
 0x762   :  { %1906 = vtanh.f32 %v2339_v36  ;;  %v2342_v39 = vadd.f32 %v547_v38, %v539_v37  ;;  %v779_v26 = vrot.slane %v2339_v36, 2 }
 0x764   :  { %1908 = vtanh.f32 %v2342_v39  ;;  %v703_v32 = vrot.slane %v2342_v39, 6 }
 0x76f   :  { %v1907_v40 = vpop.eup %1906 }
 0x770   :  { %631 = vrot.lane.b32.xlu1 %v1907_v40, %s2145_s1 }
 0x771   :  { %v1909_v41 = vpop.eup %1908 }
 0x772   :  { %552 = vrot.lane.b32.xlu0 %v1909_v41, %s2145_s1 }
 0x7e2   :  { %v632_v43 = vpop.permute.xlu1 %631 }
 0x7e3   :  { %v2348_v44 = vmul.f32 %v1903_v24, %v632_v43 }
 0x7e4   :  { %v553_v47 = vpop.permute.xlu0 %552 }
 0x7e5   :  { %v640_v46 = vrot.slane %v2348_v44, 4  ;;  %v722_v48 = vpack.c.bf16 %v2348_v44, %v2348_v44  ;;  %v2354_v49 = vmul.f32 %v1905_v27, %v553_v47 }
 0x7e7   :  { %v2356_v51 = vadd.f32 %v640_v46, %v476_v45  ;;  %v724_v52 = vrot.slane %v722_v48, 1  ;;  %v643_v54 = vpack.c.bf16 %v2354_v49, %v2354_v49 }
 0x7e9   :  { %725 = vrot.lane.b32.xlu1 %v724_v52, %s2150_s3  ;;  %v645_v55 = vrot.slane %v643_v54, 2 }
 0x7eb   :  { %646 = vrot.lane.b32.xlu0 %v645_v55, %s2150_s3 }
 0x85b   :  { %v726_v56 = vpop.permute.xlu1 %725 }
 0x85c   :  { %1771 = vmatmul.mubr.msk.bf16.vlgmr.msra.gmra.mxu0 %vm161_vm2, %v726_v56 }
 0x85d   :  { %1783 = vmatpush3.bf16.msra.mxu0 %v2217_v9  ;;  %1786 = vmatprep.mubr.msk.bf16.mxu0 %vm2149_vm0, %v2147_v0  ;;  %v647_v57 = vpop.permute.xlu0 %646 }
 0x85e   :  { %1784 = vmatprep.subr.bf16.mxu0 %v2147_v0  ;;  %1763 = vmatmul.mubr.msk.bf16.vlgmr.msra.gmra.mxu1 %vm161_vm2, %v647_v57 }
 0x85f   :  { %1775 = vmatpush3.bf16.msra.mxu1 %v2211_v3  ;;  %1778 = vmatprep.mubr.msk.bf16.mxu1 %vm2149_vm0, %v2147_v0 }
 0x860   :  { %1776 = vmatprep.subr.bf16.mxu1 %v2147_v0 }
 0x861   :  { %1785 = vmatpush3.bf16.msra.mxu0 %v2222_v10 }
 0x862   :  { %1798 = vmatprep.subr.bf16.mxu0 %v2147_v0 }
 0x863   :  { %1777 = vmatpush3.bf16.msra.mxu1 %v2214_v8 }
 0x864   :  { %1790 = vmatprep.subr.bf16.mxu1 %v2147_v0 }
 0x91c   :  { %v764_v58 = vpop.f32.mrf.mxu0 }
 0x91d   :  { %v770_v59 = vadd.f32 %v764_v58, %v2251_v29 }
 0x91e   :  { %v1772_v61 = vpop.f32.mrf.mxu0  ;;  %v685_v62 = vpop.f32.mrf.mxu1 }
 0x91f   :  { %1910 = vtanh.f32 %v770_v59  ;;  %v692_v1 = vrot.slane %v685_v62, 2  ;;  %v1645_v14 = vmul.f32 -1.442695, %v770_v59 }
 0x920   :  { %v767_v2 = vpop.f32.mrf.mxu0  ;;  %v1764_v4 = vpop.f32.mrf.mxu1 }
 0x921   :  { %v694_v5 = vadd.f32 %v692_v1, %v2249_v28 }
 0x922   :  { %v1773_v6 = vpop.f32.mrf.mxu0  ;;  %v688_v7 = vpop.f32.mrf.mxu1 }
 0x923   :  { %1912 = vtanh.f32 %v694_v5  ;;  %v1643_v29 = vmul.f32 -1.442695, %v694_v5 }
 0x924   :  { %v1765_v11 = vpop.f32.mrf.mxu1  ;;  %1914 = vpow2.f32 %v1645_v14 }
 0x925   :  { %1916 = vpow2.f32 %v1643_v29 }
 0x92c   :  { %v1911_v12 = vpop.eup %1910 }
 0x92d   :  { %783 = vrot.lane.b32.xlu0 %v1911_v12, %s2145_s1 }
 0x930   :  { %v1913_v13 = vpop.eup %1912 }
 0x931   :  { %707 = vrot.lane.b32.xlu1 %v1913_v13, %s2145_s1  ;;  %v1915_v15 = vpop.eup %1914 }
 0x932   :  { %v774_v16 = vadd.f32 1.0, %v1915_v15  ;;  %v1917_v17 = vpop.eup %1916 }
 0x933   :  { %v698_v18 = vadd.f32 1.0, %v1917_v17 }
 0x934   :  { %1918 = vrcp.f32 %v774_v16 }
 0x935   :  { %1920 = vrcp.f32 %v698_v18 }
 0x941   :  { %v1919_v28 = vpop.eup %1918 }
 0x942   :  { %v1921_v22 = vpop.eup %1920  ;;  %v781_v27 = vmul.f32 %v1919_v28, %v779_v26 }
 0x943   :  { %v705_v33 = vmul.f32 %v1921_v22, %v703_v32 }
 0x99f   :  { %v784_v19 = vpop.permute.xlu0 %783 }
 0x9a0   :  { %v786_v21 = vmul.f32 %v1919_v28, %v784_v19 }
 0x9a2   :  { %788 = vrot.lane.b32.xlu0 %v786_v21, %s2150_s3 }
 0x9a3   :  { %v708_v24 = vpop.permute.xlu1 %707 }
 0x9a4   :  { %v710_v25 = vmul.f32 %v1921_v22, %v708_v24 }
 0x9a6   :  { %712 = vrot.lane.b32.xlu1 %v710_v25, %s2150_s3 }
 0xa14   :  { %v789_v30 = vpop.permute.xlu0 %788 }
 0xa15   :  { %v2383_v31 = vadd.f32 %v789_v30, %v781_v27 }
 0xa17   :  { %1922 = vtanh.f32 %v2383_v31 }
 0xa18   :  { %v713_v34 = vpop.permute.xlu1 %712 }
 0xa19   :  { %v2387_v35 = vadd.f32 %v713_v34, %v705_v33 }
 0xa1b   :  { %1924 = vtanh.f32 %v2387_v35  ;;  %v863_v24 = vrot.slane %v2387_v35, 6 }
 0xa24   :  { %v1923_v37 = vpop.eup %1922 }
 0xa25   :  { %794 = vrot.lane.b32.xlu0 %v1923_v37, %s2145_s1 }
 0xa28   :  { %v1925_v38 = vpop.eup %1924 }
 0xa29   :  { %718 = vrot.lane.b32.xlu1 %v1925_v38, %s2145_s1 }
 0xa97   :  { %v795_v36 = vpop.permute.xlu0 %794 }
 0xa98   :  { %v2392_v40 = vmul.f32 %v1919_v28, %v795_v36  ;;  %v941_v28 = vrot.slane %v2383_v31, 2 }
 0xa9a   :  { %v882_v39 = vpack.c.bf16 %v2392_v40, %v2392_v40  ;;  %v803_v31 = vrot.slane %v2392_v40, 2 }
 0xa9b   :  { %v719_v41 = vpop.permute.xlu1 %718 }
 0xa9c   :  { %884 = vrot.lane.b32.xlu0 %v882_v39, %s2150_s3  ;;  %v2397_v42 = vmul.f32 %v1921_v22, %v719_v41  ;;  %v805_v34 = vadd.f32 %v803_v31, %v2356_v51 }
 0xa9e   :  { %v806_v43 = vpack.c.bf16 %v2397_v42, %v2397_v42 }
 0xaa0   :  { %v808_v45 = vrot.slane %v806_v43, 3 }
 0xaa2   :  { %809 = vrot.lane.b32.xlu1 %v808_v45, %s2150_s3 }
 0xb0e   :  { %v885_v46 = vpop.permute.xlu0 %884 }
 0xb0f   :  { %1787 = vmatmul.mubr.msk.bf16.vlgmr.msra.gmra.mxu0 %vm161_vm2, %v885_v46 }
 0xb10   :  { %1799 = vmatpush3.bf16.msra.mxu0 %v2217_v9  ;;  %1802 = vmatprep.mubr.msk.bf16.mxu0 %vm2149_vm0, %v2147_v0 }
 0xb11   :  { %1800 = vmatprep.subr.bf16.mxu0 %v2147_v0 }
 0xb14   :  { %1801 = vmatpush3.bf16.msra.mxu0 %v2222_v10  ;;  %v810_v47 = vpop.permute.xlu1 %809 }
 0xb15   :  { %1814 = vmatprep.subr.bf16.mxu0 %v2147_v0  ;;  %1779 = vmatmul.mubr.msk.bf16.vlgmr.msra.gmra.mxu1 %vm161_vm2, %v810_v47 }
 0xb16   :  { %1791 = vmatpush3.bf16.msra.mxu1 %v2211_v3  ;;  %1794 = vmatprep.mubr.msk.bf16.mxu1 %vm2149_vm0, %v2147_v0 }
 0xb17   :  { %1792 = vmatprep.subr.bf16.mxu1 %v2147_v0 }
 0xb1a   :  { %1793 = vmatpush3.bf16.msra.mxu1 %v2214_v8 }
 0xb1b   :  { %1806 = vmatprep.subr.bf16.mxu1 %v2147_v0 }
 0xbcf   :  { %v923_v48 = vpop.f32.mrf.mxu0 }
 0xbd0   :  { %v930_v52 = vrot.slane %v923_v48, 2 }
 0xbd1   :  { %v1788_v54 = vpop.f32.mrf.mxu0 }
 0xbd2   :  { %v932_v55 = vadd.f32 %v930_v52, %v2245_v20 }
 0xbd3   :  { %v926_v56 = vpop.f32.mrf.mxu0 }
 0xbd4   :  { %1926 = vtanh.f32 %v932_v55  ;;  %v1649_v5 = vmul.f32 -1.442695, %v932_v55 }
 0xbd5   :  { %v1789_v57 = vpop.f32.mrf.mxu0  ;;  %v848_v58 = vpop.f32.mrf.mxu1 }
 0xbd6   :  { %v854_v59 = vadd.f32 %v848_v58, %v2247_v23 }
 0xbd7   :  { %v1780_v61 = vpop.f32.mrf.mxu1 }
 0xbd8   :  { %1928 = vtanh.f32 %v854_v59  ;;  %v1647_v6 = vmul.f32 -1.442695, %v854_v59 }
 0xbd9   :  { %v851_v62 = vpop.f32.mrf.mxu1  ;;  %1930 = vpow2.f32 %v1649_v5 }
 0xbda   :  { %1932 = vpow2.f32 %v1647_v6 }
 0xbdb   :  { %v1781_v1 = vpop.f32.mrf.mxu1 }
 0xbe1   :  { %v1927_v2 = vpop.eup %1926 }
 0xbe2   :  { %945 = vrot.lane.b32.xlu0 %v1927_v2, %s2145_s1 }
 0xbe5   :  { %v1929_v4 = vpop.eup %1928 }
 0xbe6   :  { %867 = vrot.lane.b32.xlu1 %v1929_v4, %s2145_s1  ;;  %v1931_v7 = vpop.eup %1930 }
 0xbe7   :  { %v936_v11 = vadd.f32 1.0, %v1931_v7  ;;  %v1933_v12 = vpop.eup %1932 }
 0xbe8   :  { %v858_v13 = vadd.f32 1.0, %v1933_v12 }
 0xbe9   :  { %1934 = vrcp.f32 %v936_v11 }
 0xbea   :  { %1936 = vrcp.f32 %v858_v13 }
 0xbf6   :  { %v1935_v14 = vpop.eup %1934 }
 0xbf7   :  { %v1937_v16 = vpop.eup %1936  ;;  %v943_v19 = vmul.f32 %v1935_v14, %v941_v28 }
 0xbf8   :  { %v865_v25 = vmul.f32 %v1937_v16, %v863_v24 }
 0xc54   :  { %v946_v29 = vpop.permute.xlu0 %945 }
 0xc55   :  { %v948_v15 = vmul.f32 %v1935_v14, %v946_v29 }
 0xc57   :  { %950 = vrot.lane.b32.xlu0 %v948_v15, %s2150_s3 }
 0xc58   :  { %v868_v17 = vpop.permute.xlu1 %867 }
 0xc59   :  { %v870_v18 = vmul.f32 %v1937_v16, %v868_v17 }
 0xc5b   :  { %872 = vrot.lane.b32.xlu1 %v870_v18, %s2150_s3 }
 0xcc9   :  { %v951_v21 = vpop.permute.xlu0 %950 }
 0xcca   :  { %v2423_v22 = vadd.f32 %v951_v21, %v943_v19 }
 0xccc   :  { %1938 = vtanh.f32 %v2423_v22  ;;  %v1100_v18 = vrot.slane %v2423_v22, 2 }
 0xccd   :  { %v873_v26 = vpop.permute.xlu1 %872 }
 0xcce   :  { %v2427_v27 = vadd.f32 %v873_v26, %v865_v25 }
 0xcd0   :  { %1940 = vtanh.f32 %v2427_v27  ;;  %v1021_v19 = vrot.slane %v2427_v27, 6 }
 0xcd9   :  { %v1939_v30 = vpop.eup %1938 }
 0xcda   :  { %956 = vrot.lane.b32.xlu0 %v1939_v30, %s2145_s1 }
 0xcdd   :  { %v1941_v32 = vpop.eup %1940 }
 0xcde   :  { %878 = vrot.lane.b32.xlu1 %v1941_v32, %s2145_s1 }
 0xd4c   :  { %v957_v33 = vpop.permute.xlu0 %956 }
 0xd4d   :  { %v2434_v35 = vmul.f32 %v1935_v14, %v957_v33 }
 0xd4f   :  { %v2437_v37 = vadd.f32 %v2434_v35, %v805_v34  ;;  %v1040_v38 = vpack.c.bf16 %v2434_v35, %v2434_v35 }
 0xd50   :  { %v879_v36 = vpop.permute.xlu1 %878 }
 0xd51   :  { %v1042_v39 = vrot.slane %v1040_v38, 3  ;;  %v2441_v41 = vmul.f32 %v1937_v16, %v879_v36 }
 0xd53   :  { %1043 = vrot.lane.b32.xlu1 %v1042_v39, %s2150_s3  ;;  %v962_v43 = vpack.c.bf16 %v2441_v41, %v2441_v41 }
 0xd55   :  { %964 = vrot.lane.b32.xlu0 %v962_v43, %s2150_s3 }
 0xdc5   :  { %v1044_v51 = vpop.permute.xlu1 %1043 }
 0xdc6   :  { %1803 = vmatmul.mubr.msk.bf16.vlgmr.msra.gmra.mxu0 %vm161_vm2, %v1044_v51 }
 0xdc7   :  { %1815 = vmatpush3.bf16.msra.mxu0 %v2217_v9  ;;  %1818 = vmatprep.mubr.msk.bf16.mxu0 %vm2149_vm0, %v2147_v0  ;;  %v965_v45 = vpop.permute.xlu0 %964 }
 0xdc8   :  { %1816 = vmatprep.subr.bf16.mxu0 %v2147_v0  ;;  %1795 = vmatmul.mubr.msk.bf16.vlgmr.msra.gmra.mxu1 %vm161_vm2, %v965_v45 }
 0xdc9   :  { %1807 = vmatpush3.bf16.msra.mxu1 %v2211_v3  ;;  %1810 = vmatprep.mubr.msk.bf16.mxu1 %vm2149_vm0, %v2147_v0 }
 0xdca   :  { %1808 = vmatprep.subr.bf16.mxu1 %v2147_v0 }
 0xdcb   :  { %1817 = vmatpush3.bf16.msra.mxu0 %v2222_v10 }
 0xdcc   :  { %1830 = vmatprep.subr.bf16.mxu0 %v2147_v0 }
 0xdcd   :  { %1809 = vmatpush3.bf16.msra.mxu1 %v2214_v8 }
 0xdce   :  { %1822 = vmatprep.subr.bf16.mxu1 %v2147_v0 }
 0xe86   :  { %v1082_v46 = vpop.f32.mrf.mxu0 }
 0xe87   :  { %v1089_v47 = vrot.slane %v1082_v46, 4 }
 0xe88   :  { %v1804_v48 = vpop.f32.mrf.mxu0  ;;  %v1003_v54 = vpop.f32.mrf.mxu1 }
 0xe89   :  { %v1091_v52 = vadd.f32 %v1089_v47, %v2245_v20  ;;  %v1010_v55 = vrot.slane %v1003_v54, 6 }
 0xe8a   :  { %v1085_v56 = vpop.f32.mrf.mxu0  ;;  %v1796_v57 = vpop.f32.mrf.mxu1 }
 0xe8b   :  { %1942 = vtanh.f32 %v1091_v52  ;;  %v1012_v58 = vadd.f32 %v1010_v55, %v2247_v23  ;;  %v1653_v4 = vmul.f32 -1.442695, %v1091_v52 }
 0xe8c   :  { %v1805_v59 = vpop.f32.mrf.mxu0  ;;  %v1006_v61 = vpop.f32.mrf.mxu1 }
 0xe8d   :  { %1944 = vtanh.f32 %v1012_v58  ;;  %v1651_v5 = vmul.f32 -1.442695, %v1012_v58 }
 0xe8e   :  { %v1797_v62 = vpop.f32.mrf.mxu1  ;;  %1946 = vpow2.f32 %v1653_v4 }
 0xe8f   :  { %1948 = vpow2.f32 %v1651_v5 }
 0xe98   :  { %v1943_v1 = vpop.eup %1942 }
 0xe99   :  { %1104 = vrot.lane.b32.xlu1 %v1943_v1, %s2145_s1 }
 0xe9a   :  { %v1945_v2 = vpop.eup %1944 }
 0xe9b   :  { %1025 = vrot.lane.b32.xlu0 %v1945_v2, %s2145_s1  ;;  %v1947_v6 = vpop.eup %1946 }
 0xe9c   :  { %v1949_v7 = vpop.eup %1948  ;;  %v1095_v11 = vadd.f32 1.0, %v1947_v6 }
 0xe9d   :  { %v1016_v12 = vadd.f32 1.0, %v1949_v7 }
 0xe9e   :  { %1950 = vrcp.f32 %v1095_v11 }
 0xe9f   :  { %1952 = vrcp.f32 %v1016_v12 }
 0xeab   :  { %v1951_v13 = vpop.eup %1950 }
 0xeac   :  { %v1953_v15 = vpop.eup %1952  ;;  %v1102_v28 = vmul.f32 %v1951_v13, %v1100_v18 }
 0xead   :  { %v1023_v25 = vmul.f32 %v1953_v15, %v1021_v19 }
 0xf0b   :  { %v1105_v14 = vpop.permute.xlu1 %1104 }
 0xf0c   :  { %v1107_v29 = vmul.f32 %v1951_v13, %v1105_v14 }
 0xf0d   :  { %v1026_v16 = vpop.permute.xlu0 %1025 }
 0xf0e   :  { %1109 = vrot.lane.b32.xlu1 %v1107_v29, %s2150_s3  ;;  %v1028_v17 = vmul.f32 %v1953_v15, %v1026_v16 }
 0xf10   :  { %1030 = vrot.lane.b32.xlu0 %v1028_v17, %s2150_s3 }
 0xf80   :  { %v1110_v21 = vpop.permute.xlu1 %1109 }
 0xf81   :  { %v2469_v24 = vadd.f32 %v1110_v21, %v1102_v28 }
 0xf82   :  { %v1031_v26 = vpop.permute.xlu0 %1030 }
 0xf83   :  { %1954 = vtanh.f32 %v2469_v24  ;;  %v2472_v30 = vadd.f32 %v1031_v26, %v1023_v25  ;;  %v1266_v29 = vrot.slane %v2469_v24, 2 }
 0xf85   :  { %1956 = vtanh.f32 %v2472_v30  ;;  %v1187_v16 = vrot.slane %v2472_v30, 6 }
 0xf90   :  { %v1955_v32 = vpop.eup %1954 }
 0xf91   :  { %1115 = vrot.lane.b32.xlu1 %v1955_v32, %s2145_s1 }
 0xf92   :  { %v1957_v31 = vpop.eup %1956 }
 0xf93   :  { %1036 = vrot.lane.b32.xlu0 %v1957_v31, %s2145_s1 }
0x1003   :  { %v1116_v22 = vpop.permute.xlu1 %1115 }
0x1004   :  { %v2477_v33 = vmul.f32 %v1951_v13, %v1116_v22 }
0x1005   :  { %v1037_v34 = vpop.permute.xlu0 %1036 }
0x1006   :  { %v1124_v27 = vrot.slane %v2477_v33, 6  ;;  %v1206_v38 = vpack.c.bf16 %v2477_v33, %v2477_v33  ;;  %v2482_v36 = vmul.f32 %v1953_v15, %v1037_v34 }
0x1008   :  { %v1208_v39 = vrot.slane %v1206_v38, 2  ;;  %v2485_v43 = vadd.f32 %v1124_v27, %v2437_v37  ;;  %v1127_v51 = vpack.c.bf16 %v2482_v36, %v2482_v36 }
0x100a   :  { %1209 = vrot.lane.b32.xlu1 %v1208_v39, %s2150_s3  ;;  %v1129_v45 = vrot.slane %v1127_v51, 1 }
0x100c   :  { %1130 = vrot.lane.b32.xlu0 %v1129_v45, %s2150_s3 }
0x107c   :  { %v1210_v46 = vpop.permute.xlu1 %1209 }
0x107d   :  { %1819 = vmatmul.mubr.msk.bf16.vlgmr.msra.gmra.mxu0 %vm161_vm2, %v1210_v46 }
0x107e   :  { %1831 = vmatpush3.bf16.msra.mxu0 %v2217_v9  ;;  %1834 = vmatprep.mubr.msk.bf16.mxu0 %vm2149_vm0, %v2147_v0  ;;  %v1131_v47 = vpop.permute.xlu0 %1130 }
0x107f   :  { %1832 = vmatprep.subr.bf16.mxu0 %v2147_v0  ;;  %1811 = vmatmul.mubr.msk.bf16.vlgmr.msra.gmra.mxu1 %vm161_vm2, %v1131_v47 }
0x1080   :  { %1823 = vmatpush3.bf16.msra.mxu1 %v2211_v3  ;;  %1826 = vmatprep.mubr.msk.bf16.mxu1 %vm2149_vm0, %v2147_v0 }
0x1081   :  { %1824 = vmatprep.subr.bf16.mxu1 %v2147_v0 }
0x1082   :  { %1833 = vmatpush3.bf16.msra.mxu0 %v2222_v10 }
0x1084   :  { %1825 = vmatpush3.bf16.msra.mxu1 %v2214_v8 }
0x113d   :  { %v1248_v9 = vpop.f32.mrf.mxu0 }
0x113e   :  { %v1255_v37 = vrot.slane %v1248_v9, 6 }
0x113f   :  { %v1820_v48 = vpop.f32.mrf.mxu0  ;;  %v1169_v54 = vpop.f32.mrf.mxu1 }
0x1140   :  { %v1257_v52 = vadd.f32 %v1255_v37, %v2245_v20  ;;  %v1176_v55 = vrot.slane %v1169_v54, 4 }
0x1141   :  { %v1251_v56 = vpop.f32.mrf.mxu0  ;;  %v1812_v57 = vpop.f32.mrf.mxu1 }
0x1142   :  { %1958 = vtanh.f32 %v1257_v52  ;;  %v1178_v3 = vadd.f32 %v1176_v55, %v2247_v23  ;;  %v1657_v8 = vmul.f32 -1.442695, %v1257_v52 }
0x1143   :  { %v1821_v58 = vpop.f32.mrf.mxu0  ;;  %v1172_v59 = vpop.f32.mrf.mxu1 }
0x1144   :  { %1960 = vtanh.f32 %v1178_v3  ;;  %v1655_v62 = vmul.f32 -1.442695, %v1178_v3 }
0x1145   :  { %v1813_v10 = vpop.f32.mrf.mxu1  ;;  %1962 = vpow2.f32 %v1657_v8 }
0x1146   :  { %1964 = vpow2.f32 %v1655_v62 }
0x114f   :  { %v1959_v61 = vpop.eup %1958 }
0x1150   :  { %1270 = vrot.lane.b32.xlu1 %v1959_v61, %s2145_s1 }
0x1151   :  { %v1961_v0 = vpop.eup %1960 }
0x1152   :  { %1191 = vrot.lane.b32.xlu0 %v1961_v0, %s2145_s1  ;;  %v1963_v1 = vpop.eup %1962 }
0x1153   :  { %v1965_v2 = vpop.eup %1964  ;;  %v1261_v4 = vadd.f32 1.0, %v1963_v1 }
0x1154   :  { %v1182_v5 = vadd.f32 1.0, %v1965_v2 }
0x1155   :  { %1966 = vrcp.f32 %v1261_v4 }
0x1156   :  { %1968 = vrcp.f32 %v1182_v5 }
0x1162   :  { %v1967_v6 = vpop.eup %1966 }
0x1163   :  { %v1969_v12 = vpop.eup %1968  ;;  %v1268_v15 = vmul.f32 %v1967_v6, %v1266_v29 }
0x1164   :  { %v1189_v28 = vmul.f32 %v1969_v12, %v1187_v16 }
0x11c2   :  { %v1271_v7 = vpop.permute.xlu1 %1270 }
0x11c3   :  { %v1273_v11 = vmul.f32 %v1967_v6, %v1271_v7 }
0x11c4   :  { %v1192_v13 = vpop.permute.xlu0 %1191 }
0x11c5   :  { %1275 = vrot.lane.b32.xlu1 %v1273_v11, %s2150_s3  ;;  %v1194_v14 = vmul.f32 %v1969_v12, %v1192_v13 }
0x11c7   :  { %1196 = vrot.lane.b32.xlu0 %v1194_v14, %s2150_s3 }
0x1237   :  { %v1276_v17 = vpop.permute.xlu1 %1275 }
0x1238   :  { %v2511_v18 = vadd.f32 %v1276_v17, %v1268_v15 }
0x1239   :  { %v1197_v19 = vpop.permute.xlu0 %1196 }
0x123a   :  { %1970 = vtanh.f32 %v2511_v18  ;;  %v2514_v21 = vadd.f32 %v1197_v19, %v1189_v28  ;;  %v1429_v7 = vrot.slane %v2511_v18, 2  ;;  %v636_v18 = vrot.slane %v2354_v49, 4 }
0x123b   :  { %v470_v19 = vrot.slane %v2311_v53, 2  ;;  %v1489_v53 = vrot.slane %v2477_v33, 4  ;;  %v1495_v33 = vrot.slane %v2267_v60, 6 }
0x123c   :  { %1972 = vtanh.f32 %v2514_v21  ;;  %v1353_v14 = vrot.slane %v2514_v21, 6  ;;  %v799_v21 = vrot.slane %v2397_v42, 6  ;;  %v1491_v42 = vrot.slane %v2434_v35, 6 }
0x1247   :  { %v1971_v25 = vpop.eup %1970 }
0x1248   :  { %1281 = vrot.lane.b32.xlu1 %v1971_v25, %s2145_s1 }
0x1249   :  { %v1973_v26 = vpop.eup %1972 }
0x124a   :  { %1202 = vrot.lane.b32.xlu0 %v1973_v26, %s2145_s1  ;;  %v1120_v26 = vrot.slane %v2482_v36, 2  ;;  %v1493_v36 = vrot.slane %v2307_v50, 4 }
0x12ba   :  { %v1282_v24 = vpop.permute.xlu1 %1281 }
0x12bb   :  { %v2519_v32 = vmul.f32 %v1967_v6, %v1282_v24  ;;  %v1492_v24 = vrot.slane %v2348_v44, 2 }
0x12bc   :  { %v1203_v31 = vpop.permute.xlu0 %1202 }
0x12bd   :  { %v1290_v30 = vrot.slane %v2519_v32, 4  ;;  %v1372_v22 = vpack.c.bf16 %v2519_v32, %v2519_v32  ;;  %v2524_v27 = vmul.f32 %v1969_v12, %v1203_v31  ;;  %v1488_v49 = vrot.slane %v2519_v32, 2 }
0x12be   :  { %v472_v32 = vadd.f32 %v470_v19, %v2271_v63 }
0x12bf   :  { %v1374_v34 = vrot.slane %v1372_v22, 1  ;;  %v2527_v38 = vadd.f32 %v1290_v30, %v2485_v43  ;;  %v1293_v39 = vpack.c.bf16 %v2524_v27, %v2524_v27  ;;  %v1286_v25 = vrot.slane %v2524_v27, 4 }
0x12c0   :  { %v638_v35 = vadd.f32 %v636_v18, %v472_v32 }
0x12c1   :  { %1375 = vrot.lane.b32.xlu1 %v1374_v34, %s2150_s3  ;;  %v1295_v51 = vrot.slane %v1293_v39, 2 }
0x12c2   :  { %v801_v31 = vadd.f32 %v799_v21, %v638_v35 }
0x12c3   :  { %1296 = vrot.lane.b32.xlu0 %v1295_v51, %s2150_s3 }
0x1333   :  { %v1376_v45 = vpop.permute.xlu1 %1375 }
0x1334   :  { %1835 = vmatmul.mubr.msk.bf16.vlgmr.msra.gmra.mxu0 %vm161_vm2, %v1376_v45 }
0x1335   :  { %v1297_v46 = vpop.permute.xlu0 %1296 }
0x1336   :  { %1827 = vmatmul.mubr.msk.bf16.vlgmr.msra.gmra.mxu1 %vm161_vm2, %v1297_v46 }
0x13f4   :  { %v1414_v47 = vpop.f32.mrf.mxu0 }
0x13f5   :  { %v1420_v9 = vadd.f32 %v1414_v47, %v2245_v20 }
0x13f6   :  { %v1836_v37 = vpop.f32.mrf.mxu0  ;;  %v1335_v43 = vpop.f32.mrf.mxu1 }
0x13f7   :  { %1974 = vtanh.f32 %v1420_v9  ;;  %v1342_v48 = vrot.slane %v1335_v43, 2  ;;  %v1661_v10 = vmul.f32 -1.442695, %v1420_v9 }
0x13f8   :  { %v1417_v52 = vpop.f32.mrf.mxu0  ;;  %v1828_v54 = vpop.f32.mrf.mxu1 }
0x13f9   :  { %v1344_v55 = vadd.f32 %v1342_v48, %v2247_v23 }
0x13fa   :  { %v1837_v56 = vpop.f32.mrf.mxu0  ;;  %v1338_v57 = vpop.f32.mrf.mxu1 }
0x13fb   :  { %1976 = vtanh.f32 %v1344_v55  ;;  %v1659_v20 = vmul.f32 -1.442695, %v1344_v55 }
0x13fc   :  { %v1829_v3 = vpop.f32.mrf.mxu1  ;;  %1978 = vpow2.f32 %v1661_v10 }
0x13fd   :  { %1980 = vpow2.f32 %v1659_v20 }
0x1404   :  { %v1975_v58 = vpop.eup %1974 }
0x1405   :  { %1433 = vrot.lane.b32.xlu0 %v1975_v58, %s2145_s1 }
0x1408   :  { %v1977_v59 = vpop.eup %1976 }
0x1409   :  { %1357 = vrot.lane.b32.xlu1 %v1977_v59, %s2145_s1  ;;  %v1979_v61 = vpop.eup %1978 }
0x140a   :  { %v1424_v0 = vadd.f32 1.0, %v1979_v61  ;;  %v1981_v8 = vpop.eup %1980 }
0x140b   :  { %v1348_v62 = vadd.f32 1.0, %v1981_v8 }
0x140c   :  { %1982 = vrcp.f32 %v1424_v0 }
0x140d   :  { %1984 = vrcp.f32 %v1348_v62 }
0x1419   :  { %v1983_v23 = vpop.eup %1982 }
0x141a   :  { %v1985_v4 = vpop.eup %1984  ;;  %v1431_v11 = vmul.f32 %v1983_v23, %v1429_v7 }
0x141b   :  { %v1355_v29 = vmul.f32 %v1985_v4, %v1353_v14 }
0x1477   :  { %v1434_v1 = vpop.permute.xlu0 %1433 }
0x1478   :  { %v1436_v2 = vmul.f32 %v1983_v23, %v1434_v1 }
0x147a   :  { %1438 = vrot.lane.b32.xlu0 %v1436_v2, %s2150_s3 }
0x147b   :  { %v1358_v5 = vpop.permute.xlu1 %1357 }
0x147c   :  { %v1360_v6 = vmul.f32 %v1985_v4, %v1358_v5 }
0x147e   :  { %1362 = vrot.lane.b32.xlu1 %v1360_v6, %s2150_s3 }
0x14ec   :  { %v1439_v12 = vpop.permute.xlu0 %1438 }
0x14ed   :  { %v2542_v13 = vadd.f32 %v1439_v12, %v1431_v11 }
0x14ef   :  { %1986 = vtanh.f32 %v2542_v13  ;;  %v1478_v52 = vrot.slane %v2542_v13, 2 }
0x14f0   :  { %v1363_v15 = vpop.permute.xlu1 %1362 }
0x14f1   :  { %v1365_v16 = vadd.f32 %v1363_v15, %v1355_v29 }
0x14f3   :  { %1988 = vtanh.f32 %v1365_v16 }
0x14fc   :  { %v1987_v17 = vpop.eup %1986 }
0x14fd   :  { %1444 = vrot.lane.b32.xlu0 %v1987_v17, %s2145_s1 }
0x1500   :  { %v1989_v28 = vpop.eup %1988 }
0x1501   :  { %1498 = vrot.lane.b32.xlu0 %v2271_v63, %s2150_s3  ;;  %1368 = vrot.lane.b32.xlu1 %v1989_v28, %s2145_s1 }
0x1505   :  { %1502 = vrot.lane.b32.xlu0 %v636_v18, %s2150_s3  ;;  %1500 = vrot.lane.b32.xlu1 %v470_v19, %s2150_s3 }
0x1509   :  { %1506 = vrot.lane.b32.xlu0 %v2441_v41, %s2150_s3  ;;  %1504 = vrot.lane.b32.xlu1 %v799_v21, %s2150_s3 }
0x150d   :  { %1510 = vrot.lane.b32.xlu0 %v1286_v25, %s2150_s3  ;;  %1508 = vrot.lane.b32.xlu1 %v1120_v26, %s2150_s3 }
0x1511   :  { %1526 = vrot.lane.b32.xlu0 %v1489_v53, %s2145_s1  ;;  %1524 = vrot.lane.b32.xlu1 %v1488_v49, %s2145_s1 }
0x1515   :  { %1530 = vrot.lane.b32.xlu0 %v2392_v40, %s2145_s1  ;;  %1528 = vrot.lane.b32.xlu1 %v1491_v42, %s2145_s1  ;;  %v960_v40 = vadd.f32 %v2441_v41, %v801_v31 }
0x1517   :  { %v1122_v44 = vadd.f32 %v1120_v26, %v960_v40 }
0x1519   :  { %1534 = vrot.lane.b32.xlu0 %v1493_v36, %s2145_s1  ;;  %1532 = vrot.lane.b32.xlu1 %v1492_v24, %s2145_s1  ;;  %v1288_v39 = vadd.f32 %v1286_v25, %v1122_v44 }
0x151d   :  { %1536 = vrot.lane.b32.xlu1 %v1495_v33, %s2145_s1 }
0x156f   :  { %v1445_v30 = vpop.permute.xlu0 %1444 }
0x1570   :  { %v1447_v22 = vmul.f32 %v1983_v23, %v1445_v30 }
0x1572   :  { %v1453_v51 = vrot.slane %v1447_v22, 2 }
0x1573   :  { %v2578_v27 = vpop.permute.xlu0 %1498  ;;  %v1369_v50 = vpop.permute.xlu1 %1368 }
0x1574   :  { %v1371_v34 = vmul.f32 %v1985_v4, %v1369_v50  ;;  %v1455_v41 = vadd.f32 %v1453_v51, %v2527_v38 }
0x1576   :  { %v1449_v45 = vrot.slane %v1371_v34, 6  ;;  %1468 = vrot.lane.b32.xlu0 %v1371_v34, %s2150_s3  ;;  %v1461_v43 = vrot.slane %v1455_v41, 6 }
0x1577   :  { %v1503_v60 = vpop.permute.xlu0 %1502  ;;  %v1501_v46 = vpop.permute.xlu1 %1500 }
0x1578   :  { %1512 = vrot.lane.b32.xlu1 %v1449_v45, %s2150_s3  ;;  %v1451_v63 = vadd.f32 %v1449_v45, %v1288_v39 }
0x157a   :  { %1457 = vrot.lane.b32.xlu0 %v1451_v63, %s2150_s3 }
0x157b   :  { %v1507_v47 = vpop.permute.xlu0 %1506  ;;  %v1505_v9 = vpop.permute.xlu1 %1504 }
0x157c   :  { %1470 = vrot.lane.b32.xlu1 %v1453_v51, %s2150_s3 }
0x157e   :  { %1522 = vrot.lane.b32.xlu0 %v1447_v22, %s2145_s1 }
0x157f   :  { %v1511_v37 = vpop.permute.xlu0 %1510  ;;  %v1509_v48 = vpop.permute.xlu1 %1508 }
0x1580   :  { %1462 = vrot.lane.b32.xlu1 %v1461_v43, %s2145_s1 }
0x1582   :  { %1480 = vrot.lane.b32.xlu0 %v1365_v16, %s2151_s19 }
0x1583   :  { %v1527_v54 = vpop.permute.xlu0 %1526  ;;  %v1525_v55 = vpop.permute.xlu1 %1524 }
0x1584   :  { %v1548_v56 = vsel %vm161_vm2, %v1503_v60, %v1527_v54  ;;  %v1547_v38 = vsel %vm161_vm2, %v1501_v46, %v1525_v55  ;;  %1482 = vrot.lane.b32.xlu1 %v1478_v52, %s2151_s19 }
0x1585   :  { %1556 = vst.msk [vmem:[#allocation8 + $0x4] sm:$0x3] %vm1466_vm3, %v1548_v56  ;;  %1555 = vst.msk [vmem:[#allocation8 + $0x2] sm:$0x3] %vm1466_vm3, %v1547_v38 }
0x1587   :  { %v1531_v57 = vpop.permute.xlu0 %1530  ;;  %v1529_v3 = vpop.permute.xlu1 %1528 }
0x1588   :  { %v1550_v58 = vsel %vm161_vm2, %v1507_v47, %v1531_v57  ;;  %v1549_v59 = vsel %vm161_vm2, %v1505_v9, %v1529_v3 }
0x1589   :  { %1558 = vst.msk [vmem:[#allocation8 + $0x8] sm:$0x3] %vm1466_vm3, %v1550_v58  ;;  %1557 = vst.msk [vmem:[#allocation8 + $0x6] sm:$0x3] %vm1466_vm3, %v1549_v59 }
0x158b   :  { %v1535_v10 = vpop.permute.xlu0 %1534  ;;  %v1533_v20 = vpop.permute.xlu1 %1532 }
0x158c   :  { %v1552_v61 = vsel %vm161_vm2, %v1511_v37, %v1535_v10  ;;  %v1551_v0 = vsel %vm161_vm2, %v1509_v48, %v1533_v20 }
0x158d   :  { %1560 = vst.msk [vmem:[#allocation8 + $0xc] sm:$0x3] %vm1466_vm3, %v1552_v61  ;;  %1559 = vst.msk [vmem:[#allocation8 + $0xa] sm:$0x3] %vm1466_vm3, %v1551_v0 }
0x158f   :  { %v1537_v8 = vpop.permute.xlu1 %1536 }
0x15e8   :  { %v1469_v62 = vpop.permute.xlu0 %1468 }
0x15e9   :  { %1475 = vst.msk [vmem:[#allocation11 - $0x6] sm:$0xc0] %vm1474_vm4, %v1469_v62 }
0x15ea   :  { %v1513_v23 = vpop.permute.xlu1 %1512 }
0x15eb   :  { %v1553_v1 = vsel %vm161_vm2, %v1513_v23, %v1537_v8 }
0x15ec   :  { %1561 = vst.msk [vmem:[#allocation8 + $0xe] sm:$0x3] %vm1466_vm3, %v1553_v1  ;;  %v1458_v2 = vpop.permute.xlu0 %1457 }
0x15ee   :  { %v1471_v4 = vpop.permute.xlu1 %1470 }
0x15ef   :  { %1476 = vst.msk [vmem:[#allocation11 - $0x4] sm:$0xc0] %vm1474_vm4, %v1471_v4 }
0x15f0   :  { %v1523_v5 = vpop.permute.xlu0 %1522 }
0x15f1   :  { %v1546_v6 = vsel %vm161_vm2, %v2578_v27, %v1523_v5 }
0x15f2   :  { %1554 = vst.msk [vmem:[#allocation8] sm:$0x3] %vm1466_vm3, %v1546_v6  ;;  %v1463_v7 = vpop.permute.xlu1 %1462 }
0x15f3   :  { %v1465_v11 = vsel %vm161_vm2, %v1458_v2, %v1463_v7 }
0x15f4   :  { %2061 = shalt.err (!%p2058_p5)
}
0x15f5   :  { %s2156_s29 = smov 2   ;;  %1467 = vst.msk [vmem:[#allocation9] sm:$0x3] %vm1466_vm3, %v1465_v11  ;;  %v1481_v12 = vpop.permute.xlu0 %1480  ;;  %s2070_s9 = scalar_lea.vmem %s1581_s23, 32 }
0x15f6   :  { %1573 = dma.vmem_to_hbm [thread:$0]  %s1568_s21, 256, %s2650_s4, [#allocation4], %s2150_s3, %s2150_s3, %s2156_s29   ;;  %1486 = vst.msk [vmem:[#allocation12 - $0x6] sm:$0xc0] %vm1474_vm4, %v1481_v12 }
0x15f7   :  { %p2071_p6 = scmp.ne.s32.totalorder %s1581_s23, %s2070_s9  ;;  %p2075_p7 = scmp.lt.s32.totalorder %s1581_s23, %s1581_s23 }
0x15f8   :  { %p2076_p8 = scmp.lt.s32.totalorder %s2070_s9, %s2070_s9 }
0x15fa   :  { %p2077_p9 = por %p2076_p8, %p2075_p7 }
0x15fc   :  { %p2078_p10 = pnand %p2077_p9, %p2071_p6 }
0x15fe   :  { %2081 = shalt.err (!%p2078_p10)
}
0x15ff   :  { %1583 = dma.vmem_to_hbm [thread:$0]  %s1581_s23, 32, %s2651_s5, [#allocation10]   ;;  %v1483_v13 = vpop.permute.xlu1 %1482 }
0x1600   :  { %s2090_s4 = scalar_lea.vmem %s2607_s25, 64  ;;  %p2095_p12 = scmp.lt.s32.totalorder %s2607_s25, %s2607_s25 }
0x1601   :  { %p2091_p11 = scmp.ne.s32.totalorder %s2607_s25, %s2090_s4  ;;  %p2096_p13 = scmp.lt.s32.totalorder %s2090_s4, %s2090_s4 }
0x1603   :  { %p2097_p0 = por %p2096_p13, %p2095_p12 }
0x1605   :  { %p2098_p1 = pnand %p2097_p0, %p2091_p11 }
0x1607   :  { %2101 = shalt.err (!%p2098_p1)
}
0x1608   :  { %1595 = dma.vmem_to_hbm [thread:$0]  %s2607_s25, 64, %s2652_s6, [#allocation10], %s2150_s3, %s2150_s3, %s2156_s29   ;;  %1487 = vst.msk [vmem:[#allocation12 - $0x4] sm:$0xc0] %vm1474_vm4, %v1483_v13 }
0x1609   :  { %s2110_s5 = scalar_lea.vmem %s2617_s27, 64  ;;  %p2115_p3 = scmp.lt.s32.totalorder %s2617_s27, %s2617_s27 }
0x160a   :  { %p2111_p2 = scmp.ne.s32.totalorder %s2617_s27, %s2110_s5  ;;  %p2116_p4 = scmp.lt.s32.totalorder %s2110_s5, %s2110_s5 }
0x160c   :  { %p2117_p5 = por %p2116_p4, %p2115_p3 }
0x160e   :  { %p2118_p6 = pnand %p2117_p5, %p2111_p2 }
0x1610   :  { %2121 = shalt.err (!%p2118_p6)
}
0x1611   :  { %1607 = dma.vmem_to_hbm [thread:$0]  %s2617_s27, 64, %s2653_s7, [#allocation13], %s2150_s3, %s2150_s3, %s2156_s29  }
0x1612   :  { %2134 = dma.done.wait [#allocation4], 256  }
0x1613   :  { %2135 = vsyncadd [#allocation4], 4294967040 }
0x1614   :  { %2136 = dma.done.wait [#allocation10], 96  }
0x1615   :  { %2137 = vsyncadd [#allocation10], 4294967200 }
0x1616   :  { %2138 = dma.done.wait [#allocation13], 64  }
0x1617   :  { %2139 = vsyncadd [#allocation13], 4294967232 }
0x1618   :  { %1620 = vsyncpa [#allocation3], 1 }
0x1619   :  { %1621 = vsyncpa [#allocation6], 1 }
0x161a   :  { %1622 = vsyncpa [#allocation4], 1 }
0x161b   :  { %1623 = vsyncpa [#allocation10], 1 }
0x161c   :  { %1624 = vsyncpa [#allocation13], 1 }

</bundles_post_ra>
